<compile_context>
chip_gen: v5e
topology: v5e:2x2
jax: 0.10.0
libtpu: 0.0.40
codegen_flags: <defaults>
</compile_context>

<pallas_src>
import jax
import jax.numpy as jnp
from jax.experimental import pallas as pl
from jax.experimental.pallas import tpu as pltpu

# ---- config (matches args of Actor_RNN) ----------------------------------
B = 2     # batch
T = 8     # sequence length
E = 32    # args.projection_embed_dim
H = 32    # args.hidden_dim
A = 4     # args.action_dim
assert E == H, "packed weight slab assumes fc1 input dim == hidden dim"

# Packed-slab layout: every segment starts on a 128-lane boundary.
SEG = 128
W1_OFF, WIH_OFF, WHH_OFF, W2_OFF = 0, SEG, 2 * SEG, 3 * SEG
SLAB_COLS = 4 * SEG  # 512


def actor_rnn_kernel(s_ref, w_ref, b_ref, out_ref):
    """Whole-sequence Actor_RNN forward. Everything lives in VMEM.

    s_ref:   (B, T, E) f32   batch-first input
    w_ref:   (H, 512)  bf16  [ w1 | W_ih(r|z|n) | W_hh(r|z|n) | w2 ], 128-lane segments
    b_ref:   (1, 512)  f32   [ b1 | bih+bhh(r,z),bih(n) | 0|0|bhh_n | b2 ]
    out_ref: (B, T, A) f32   logits, batch-first
    """
    f32 = jnp.float32
    bf16 = jnp.bfloat16

    # Static, lane-aligned views into the packed slabs (no data movement).
    w1 = w_ref[:, W1_OFF:W1_OFF + H]             # (E, H)
    wih = w_ref[:, WIH_OFF:WIH_OFF + 3 * H]      # (H, 3H)
    whh = w_ref[:, WHH_OFF:WHH_OFF + 3 * H]      # (H, 3H)
    w2 = w_ref[:, W2_OFF:W2_OFF + A]             # (H, A)
    b1 = b_ref[:, W1_OFF:W1_OFF + H]             # (1, H)
    gi_b = b_ref[:, WIH_OFF:WIH_OFF + 3 * H]     # (1, 3H)  bih + (bhh_r | bhh_z | 0)
    gh_b = b_ref[:, WHH_OFF:WHH_OFF + 3 * H]     # (1, 3H)  (0 | 0 | bhh_n)
    b2 = b_ref[:, W2_OFF:W2_OFF + A]             # (1, A)

    # ---- hoisted, non-recurrent compute: batched over all B*T rows -------
    x = s_ref[...].reshape(B * T, E).astype(bf16)                      # (BT, E)
    x1 = jnp.tanh(jnp.dot(x, w1, preferred_element_type=f32) + b1)     # (BT, H) f32
    gi = (jnp.dot(x1.astype(bf16), wih, preferred_element_type=f32)
          + gi_b).reshape(B, T, 3 * H)                                 # (B, T, 3H)

    # ---- recurrence: static fully-unrolled loop; h stays in vregs --------
    h = jnp.zeros((B, H), f32)       # module's actor_rnn_hidden starts as None
    hs = []
    for t in range(T):
        # single fused h @ W_hh for all three gates (one MXU round-trip / step)
        gh = jnp.dot(h.astype(bf16), whh, preferred_element_type=f32) + gh_b
        g = gi[:, t, :]
        rz = jax.nn.sigmoid(g[:, :2 * H] + gh[:, :2 * H])   # fused r|z sigmoid
        r = rz[:, :H]
        z = rz[:, H:]
        n = jnp.tanh(g[:, 2 * H:] + r * gh[:, 2 * H:])
        h = n + z * (h - n)                                  # == (1-z)*n + z*h
        hs.append(h)

    # ---- hoisted fc2 over all timesteps; single batch-first store --------
    h_all = jnp.stack(hs, axis=1).reshape(B * T, H)                    # (BT, H)
    logits = jnp.dot(h_all.astype(bf16), w2, preferred_element_type=f32) + b2
    out_ref[...] = logits.reshape(B, T, A).astype(out_ref.dtype)


def actor_rnn_forward(s_btE, w_slab, b_slab):
    """s_btE: (B, T, E) batch_first, like the PyTorch module. Returns (B, T, A)."""
    vmem = pl.BlockSpec(memory_space=pltpu.MemorySpace.VMEM)
    return pl.pallas_call(
        actor_rnn_kernel,
        out_shape=jax.ShapeDtypeStruct((B, T, A), jnp.float32),
        in_specs=[vmem, vmem, vmem],
        out_specs=vmem,
    )(s_btE, w_slab, b_slab)


# ---- deterministic parameter init (orthogonal weights, mimicking the module) ----
def _orthogonal(key, shape, gain):
    a = jax.random.normal(key, shape, dtype=jnp.float32)
    q, r = jnp.linalg.qr(a if shape[0] >= shape[1] else a.T)
    q = q * jnp.sign(jnp.diag(r))[None, :]
    if shape[0] < shape[1]:
        q = q.T
    return gain * q[:shape[0], :shape[1]]


def _split_gates(w_3h_h):
    """(3H, H) PyTorch (out, in) stacked layout -> (3, H, H) gate-major (in, out)."""
    return jnp.stack([w_3h_h[g * H:(g + 1) * H, :].T for g in range(3)], axis=0)


def make_params(key):
    ks = jax.random.split(key, 8)
    w1 = _orthogonal(ks[0], (H, E), 0.7).T                               # (E, H)
    wih = _split_gates(_orthogonal(ks[1], (3 * H, H), jnp.sqrt(2.0)))    # (3, H, H)
    whh = _split_gates(_orthogonal(ks[2], (3 * H, H), jnp.sqrt(2.0)))    # (3, H, H)
    w2 = _orthogonal(ks[3], (A, H), 0.01).T                              # (H, A)
    # The module zero-inits biases under orthogonal init; nonzero random biases
    # are used here so the allclose check also validates bias placement
    # (in particular that bhh_n is multiplied by r, PyTorch GRU semantics).
    b1 = 0.1 * jax.random.normal(ks[4], (1, H), dtype=jnp.float32)
    bih = 0.1 * jax.random.normal(ks[5], (3, 1, H), dtype=jnp.float32)
    bhh = 0.1 * jax.random.normal(ks[6], (3, 1, H), dtype=jnp.float32)
    b2 = 0.1 * jax.random.normal(ks[7], (1, A), dtype=jnp.float32)
    return dict(w1=w1, b1=b1, wih=wih, bih=bih, whh=whh, bhh=bhh, w2=w2, b2=b2)


def pack_params(p):
    """Pack all weights/biases into one bf16 weight slab and one f32 bias slab."""
    wih_cat = jnp.concatenate([p["wih"][0], p["wih"][1], p["wih"][2]], axis=1)  # (H, 3H)
    whh_cat = jnp.concatenate([p["whh"][0], p["whh"][1], p["whh"][2]], axis=1)  # (H, 3H)

    w_slab = jnp.zeros((H, SLAB_COLS), jnp.float32)
    w_slab = w_slab.at[:, W1_OFF:W1_OFF + H].set(p["w1"])
    w_slab = w_slab.at[:, WIH_OFF:WIH_OFF + 3 * H].set(wih_cat)
    w_slab = w_slab.at[:, WHH_OFF:WHH_OFF + 3 * H].set(whh_cat)
    w_slab = w_slab.at[:, W2_OFF:W2_OFF + A].set(p["w2"])
    w_slab = w_slab.astype(jnp.bfloat16)

    # bhh_r / bhh_z commute with the recurrence -> folded into the gi bias.
    gi_bias = jnp.concatenate([p["bih"][0] + p["bhh"][0],
                               p["bih"][1] + p["bhh"][1],
                               p["bih"][2]], axis=1)                    # (1, 3H)
    b_slab = jnp.zeros((1, SLAB_COLS), jnp.float32)
    b_slab = b_slab.at[:, W1_OFF:W1_OFF + H].set(p["b1"])
    b_slab = b_slab.at[:, WIH_OFF:WIH_OFF + 3 * H].set(gi_bias)
    b_slab = b_slab.at[:, WHH_OFF + 2 * H:WHH_OFF + 3 * H].set(p["bhh"][2])  # bhh_n only
    b_slab = b_slab.at[:, W2_OFF:W2_OFF + A].set(p["b2"])
    return w_slab, b_slab


# ---- pure-JAX reference (PyTorch fc1 -> tanh -> GRU -> fc2 semantics) ----------
def reference_forward(s_btE, p, matmul_dtype=jnp.float32):
    """matmul_dtype=bf16 mirrors the kernel's MXU-native operand precision."""
    def mm(a, b):
        return jnp.dot(a.astype(matmul_dtype), b.astype(matmul_dtype),
                       preferred_element_type=jnp.float32)

    x1 = jnp.tanh(mm(s_btE.reshape(B * T, E), p["w1"]).reshape(B, T, H) + p["b1"][0])
    h = jnp.zeros((B, H), jnp.float32)
    outs = []
    for t in range(T):
        xt = x1[:, t, :]
        gi_r = mm(xt, p["wih"][0]) + p["bih"][0, 0]
        gi_z = mm(xt, p["wih"][1]) + p["bih"][1, 0]
        gi_n = mm(xt, p["wih"][2]) + p["bih"][2, 0]
        gh_r = mm(h, p["whh"][0]) + p["bhh"][0, 0]
        gh_z = mm(h, p["whh"][1]) + p["bhh"][1, 0]
        gh_n = mm(h, p["whh"][2]) + p["bhh"][2, 0]
        r = jax.nn.sigmoid(gi_r + gh_r)
        z = jax.nn.sigmoid(gi_z + gh_z)
        n = jnp.tanh(gi_n + r * gh_n)
        h = (1.0 - z) * n + z * h
        outs.append(mm(h, p["w2"]) + p["b2"][0])
    return jnp.stack(outs, axis=1)  # (B, T, A)


if __name__ == "__main__":
    key = jax.random.PRNGKey(0)
    kp, ks = jax.random.split(key)
    params = make_params(kp)
    w_slab, b_slab = pack_params(params)
    s = jax.random.normal(ks, (B, T, E), dtype=jnp.float32)  # batch_first input

    logits = jax.block_until_ready(actor_rnn_forward(s, w_slab, b_slab))

    # Tight check against a reference with identical (bf16-operand, f32-accum)
    # matmul numerics; loose sanity check against a full-f32-operand reference.
    ref_bf16 = reference_forward(s, params, matmul_dtype=jnp.bfloat16)
    ref_f32 = reference_forward(s, params, matmul_dtype=jnp.float32)

    assert logits.shape == (B, T, A)
    assert jnp.allclose(logits, ref_bf16, atol=2e-3, rtol=2e-3), "mismatch vs bf16 reference"
    assert jnp.allclose(logits, ref_f32, atol=1e-2, rtol=1e-1), "mismatch vs f32 reference"
    print("KERNEL_OK")
</pallas_src>

<mosaic_0001>
module attributes {stable_mosaic.version = 11 : i64} {
  func.func @actor_rnn_kernel(%arg0: memref<2x8x32xf32, #tpu.memory_space<vmem>>, %arg1: memref<32x512xbf16, #tpu.memory_space<vmem>>, %arg2: memref<1x512xf32, #tpu.memory_space<vmem>>, %arg3: memref<2x8x4xf32, #tpu.memory_space<vmem>>) attributes {dimension_semantics = [], scalar_prefetch = 0 : i64, scratch_operands = 0 : i64, tpu.core_type = #tpu.core_type<tc>} {
    %c0 = arith.constant 0 : index
    %c0_0 = arith.constant 0 : index
    %0 = vector.load %arg1[%c0, %c0_0] : memref<32x512xbf16, #tpu.memory_space<vmem>>, vector<32x32xbf16>
    %c0_1 = arith.constant 0 : index
    %c128 = arith.constant 128 : index
    %1 = vector.load %arg1[%c0_1, %c128] : memref<32x512xbf16, #tpu.memory_space<vmem>>, vector<32x96xbf16>
    %c0_2 = arith.constant 0 : index
    %c256 = arith.constant 256 : index
    %2 = vector.load %arg1[%c0_2, %c256] : memref<32x512xbf16, #tpu.memory_space<vmem>>, vector<32x96xbf16>
    %c0_3 = arith.constant 0 : index
    %c384 = arith.constant 384 : index
    %3 = vector.load %arg1[%c0_3, %c384] : memref<32x512xbf16, #tpu.memory_space<vmem>>, vector<32x4xbf16>
    %c0_4 = arith.constant 0 : index
    %c0_5 = arith.constant 0 : index
    %4 = vector.load %arg2[%c0_4, %c0_5] : memref<1x512xf32, #tpu.memory_space<vmem>>, vector<1x32xf32>
    %c0_6 = arith.constant 0 : index
    %c128_7 = arith.constant 128 : index
    %5 = vector.load %arg2[%c0_6, %c128_7] : memref<1x512xf32, #tpu.memory_space<vmem>>, vector<1x96xf32>
    %c0_8 = arith.constant 0 : index
    %c256_9 = arith.constant 256 : index
    %6 = vector.load %arg2[%c0_8, %c256_9] : memref<1x512xf32, #tpu.memory_space<vmem>>, vector<1x96xf32>
    %c0_10 = arith.constant 0 : index
    %c384_11 = arith.constant 384 : index
    %7 = vector.load %arg2[%c0_10, %c384_11] : memref<1x512xf32, #tpu.memory_space<vmem>>, vector<1x4xf32>
    %c0_12 = arith.constant 0 : index
    %c0_13 = arith.constant 0 : index
    %c0_14 = arith.constant 0 : index
    %8 = vector.load %arg0[%c0_12, %c0_13, %c0_14] : memref<2x8x32xf32, #tpu.memory_space<vmem>>, vector<2x8x32xf32>
    %9 = vector.shape_cast %8 : vector<2x8x32xf32> to vector<16x32xf32>
    %10 = arith.truncf %9 : vector<16x32xf32> to vector<16x32xbf16>
    %cst = arith.constant dense<0.000000e+00> : vector<16x32xf32>
    %11 = tpu.matmul %10, %0, %cst {dimension_numbers = #tpu.dot_dimension_numbers<[1], [0], [0], [1], [0, 0, 1, 1], [], []>} : vector<16x32xbf16>, vector<32x32xbf16>, vector<16x32xf32> -> vector<16x32xf32>
    %12 = vector.broadcast %4 : vector<1x32xf32> to vector<16x32xf32>
    %13 = arith.addf %11, %12 : vector<16x32xf32>
    %14 = math.tanh %13 : vector<16x32xf32>
    %15 = arith.truncf %14 : vector<16x32xf32> to vector<16x32xbf16>
    %cst_15 = arith.constant dense<0.000000e+00> : vector<16x96xf32>
    %16 = tpu.matmul %15, %1, %cst_15 {dimension_numbers = #tpu.dot_dimension_numbers<[1], [0], [0], [1], [0, 0, 1, 1], [], []>} : vector<16x32xbf16>, vector<32x96xbf16>, vector<16x96xf32> -> vector<16x96xf32>
    %17 = vector.broadcast %5 : vector<1x96xf32> to vector<16x96xf32>
    %18 = arith.addf %16, %17 : vector<16x96xf32>
    %19 = vector.shape_cast %18 : vector<16x96xf32> to vector<2x8x96xf32>
    %cst_16 = arith.constant 0.000000e+00 : f32
    %20 = vector.broadcast %cst_16 : f32 to vector<2x32xf32>
    %21 = arith.truncf %20 : vector<2x32xf32> to vector<2x32xbf16>
    %cst_17 = arith.constant dense<0.000000e+00> : vector<2x96xf32>
    %22 = tpu.matmul %21, %2, %cst_17 {dimension_numbers = #tpu.dot_dimension_numbers<[1], [0], [0], [1], [0, 0, 1, 1], [], []>} : vector<2x32xbf16>, vector<32x96xbf16>, vector<2x96xf32> -> vector<2x96xf32>
    %23 = vector.broadcast %6 : vector<1x96xf32> to vector<2x96xf32>
    %24 = arith.addf %22, %23 : vector<2x96xf32>
    %25 = vector.extract_strided_slice %19 {offsets = [0, 0, 0], sizes = [2, 1, 96], strides = [1, 1, 1]} : vector<2x8x96xf32> to vector<2x1x96xf32>
    %26 = vector.shape_cast %25 : vector<2x1x96xf32> to vector<2x96xf32>
    %27 = vector.extract_strided_slice %26 {offsets = [0, 0], sizes = [2, 64], strides = [1, 1]} : vector<2x96xf32> to vector<2x64xf32>
    %28 = vector.extract_strided_slice %24 {offsets = [0, 0], sizes = [2, 64], strides = [1, 1]} : vector<2x96xf32> to vector<2x64xf32>
    %29 = arith.addf %27, %28 : vector<2x64xf32>
    %30 = arith.negf %29 : vector<2x64xf32>
    %31 = math.exp %30 : vector<2x64xf32>
    %cst_18 = arith.constant 1.000000e+00 : f32
    %32 = vector.broadcast %cst_18 : f32 to vector<2x64xf32>
    %33 = arith.addf %32, %31 : vector<2x64xf32>
    %34 = arith.divf %32, %33 : vector<2x64xf32>
    %35 = vector.extract_strided_slice %34 {offsets = [0, 0], sizes = [2, 32], strides = [1, 1]} : vector<2x64xf32> to vector<2x32xf32>
    %36 = vector.extract_strided_slice %34 {offsets = [0, 32], sizes = [2, 32], strides = [1, 1]} : vector<2x64xf32> to vector<2x32xf32>
    %37 = vector.extract_strided_slice %26 {offsets = [0, 64], sizes = [2, 32], strides = [1, 1]} : vector<2x96xf32> to vector<2x32xf32>
    %38 = vector.extract_strided_slice %24 {offsets = [0, 64], sizes = [2, 32], strides = [1, 1]} : vector<2x96xf32> to vector<2x32xf32>
    %39 = arith.mulf %35, %38 : vector<2x32xf32>
    %40 = arith.addf %37, %39 : vector<2x32xf32>
    %41 = math.tanh %40 : vector<2x32xf32>
    %42 = arith.subf %20, %41 : vector<2x32xf32>
    %43 = arith.mulf %36, %42 : vector<2x32xf32>
    %44 = arith.addf %41, %43 : vector<2x32xf32>
    %45 = arith.truncf %44 : vector<2x32xf32> to vector<2x32xbf16>
    %cst_19 = arith.constant dense<0.000000e+00> : vector<2x96xf32>
    %46 = tpu.matmul %45, %2, %cst_19 {dimension_numbers = #tpu.dot_dimension_numbers<[1], [0], [0], [1], [0, 0, 1, 1], [], []>} : vector<2x32xbf16>, vector<32x96xbf16>, vector<2x96xf32> -> vector<2x96xf32>
    %47 = vector.broadcast %6 : vector<1x96xf32> to vector<2x96xf32>
    %48 = arith.addf %46, %47 : vector<2x96xf32>
    %49 = vector.extract_strided_slice %19 {offsets = [0, 1, 0], sizes = [2, 1, 96], strides = [1, 1, 1]} : vector<2x8x96xf32> to vector<2x1x96xf32>
    %50 = vector.shape_cast %49 : vector<2x1x96xf32> to vector<2x96xf32>
    %51 = vector.extract_strided_slice %50 {offsets = [0, 0], sizes = [2, 64], strides = [1, 1]} : vector<2x96xf32> to vector<2x64xf32>
    %52 = vector.extract_strided_slice %48 {offsets = [0, 0], sizes = [2, 64], strides = [1, 1]} : vector<2x96xf32> to vector<2x64xf32>
    %53 = arith.addf %51, %52 : vector<2x64xf32>
    %54 = arith.negf %53 : vector<2x64xf32>
    %55 = math.exp %54 : vector<2x64xf32>
    %cst_20 = arith.constant 1.000000e+00 : f32
    %56 = vector.broadcast %cst_20 : f32 to vector<2x64xf32>
    %57 = arith.addf %56, %55 : vector<2x64xf32>
    %58 = arith.divf %56, %57 : vector<2x64xf32>
    %59 = vector.extract_strided_slice %58 {offsets = [0, 0], sizes = [2, 32], strides = [1, 1]} : vector<2x64xf32> to vector<2x32xf32>
    %60 = vector.extract_strided_slice %58 {offsets = [0, 32], sizes = [2, 32], strides = [1, 1]} : vector<2x64xf32> to vector<2x32xf32>
    %61 = vector.extract_strided_slice %50 {offsets = [0, 64], sizes = [2, 32], strides = [1, 1]} : vector<2x96xf32> to vector<2x32xf32>
    %62 = vector.extract_strided_slice %48 {offsets = [0, 64], sizes = [2, 32], strides = [1, 1]} : vector<2x96xf32> to vector<2x32xf32>
    %63 = arith.mulf %59, %62 : vector<2x32xf32>
    %64 = arith.addf %61, %63 : vector<2x32xf32>
    %65 = math.tanh %64 : vector<2x32xf32>
    %66 = arith.subf %44, %65 : vector<2x32xf32>
    %67 = arith.mulf %60, %66 : vector<2x32xf32>
    %68 = arith.addf %65, %67 : vector<2x32xf32>
    %69 = arith.truncf %68 : vector<2x32xf32> to vector<2x32xbf16>
    %cst_21 = arith.constant dense<0.000000e+00> : vector<2x96xf32>
    %70 = tpu.matmul %69, %2, %cst_21 {dimension_numbers = #tpu.dot_dimension_numbers<[1], [0], [0], [1], [0, 0, 1, 1], [], []>} : vector<2x32xbf16>, vector<32x96xbf16>, vector<2x96xf32> -> vector<2x96xf32>
    %71 = vector.broadcast %6 : vector<1x96xf32> to vector<2x96xf32>
    %72 = arith.addf %70, %71 : vector<2x96xf32>
    %73 = vector.extract_strided_slice %19 {offsets = [0, 2, 0], sizes = [2, 1, 96], strides = [1, 1, 1]} : vector<2x8x96xf32> to vector<2x1x96xf32>
    %74 = vector.shape_cast %73 : vector<2x1x96xf32> to vector<2x96xf32>
    %75 = vector.extract_strided_slice %74 {offsets = [0, 0], sizes = [2, 64], strides = [1, 1]} : vector<2x96xf32> to vector<2x64xf32>
    %76 = vector.extract_strided_slice %72 {offsets = [0, 0], sizes = [2, 64], strides = [1, 1]} : vector<2x96xf32> to vector<2x64xf32>
    %77 = arith.addf %75, %76 : vector<2x64xf32>
    %78 = arith.negf %77 : vector<2x64xf32>
    %79 = math.exp %78 : vector<2x64xf32>
    %cst_22 = arith.constant 1.000000e+00 : f32
    %80 = vector.broadcast %cst_22 : f32 to vector<2x64xf32>
    %81 = arith.addf %80, %79 : vector<2x64xf32>
    %82 = arith.divf %80, %81 : vector<2x64xf32>
    %83 = vector.extract_strided_slice %82 {offsets = [0, 0], sizes = [2, 32], strides = [1, 1]} : vector<2x64xf32> to vector<2x32xf32>
    %84 = vector.extract_strided_slice %82 {offsets = [0, 32], sizes = [2, 32], strides = [1, 1]} : vector<2x64xf32> to vector<2x32xf32>
    %85 = vector.extract_strided_slice %74 {offsets = [0, 64], sizes = [2, 32], strides = [1, 1]} : vector<2x96xf32> to vector<2x32xf32>
    %86 = vector.extract_strided_slice %72 {offsets = [0, 64], sizes = [2, 32], strides = [1, 1]} : vector<2x96xf32> to vector<2x32xf32>
    %87 = arith.mulf %83, %86 : vector<2x32xf32>
    %88 = arith.addf %85, %87 : vector<2x32xf32>
    %89 = math.tanh %88 : vector<2x32xf32>
    %90 = arith.subf %68, %89 : vector<2x32xf32>
    %91 = arith.mulf %84, %90 : vector<2x32xf32>
    %92 = arith.addf %89, %91 : vector<2x32xf32>
    %93 = arith.truncf %92 : vector<2x32xf32> to vector<2x32xbf16>
    %cst_23 = arith.constant dense<0.000000e+00> : vector<2x96xf32>
    %94 = tpu.matmul %93, %2, %cst_23 {dimension_numbers = #tpu.dot_dimension_numbers<[1], [0], [0], [1], [0, 0, 1, 1], [], []>} : vector<2x32xbf16>, vector<32x96xbf16>, vector<2x96xf32> -> vector<2x96xf32>
    %95 = vector.broadcast %6 : vector<1x96xf32> to vector<2x96xf32>
    %96 = arith.addf %94, %95 : vector<2x96xf32>
    %97 = vector.extract_strided_slice %19 {offsets = [0, 3, 0], sizes = [2, 1, 96], strides = [1, 1, 1]} : vector<2x8x96xf32> to vector<2x1x96xf32>
    %98 = vector.shape_cast %97 : vector<2x1x96xf32> to vector<2x96xf32>
    %99 = vector.extract_strided_slice %98 {offsets = [0, 0], sizes = [2, 64], strides = [1, 1]} : vector<2x96xf32> to vector<2x64xf32>
    %100 = vector.extract_strided_slice %96 {offsets = [0, 0], sizes = [2, 64], strides = [1, 1]} : vector<2x96xf32> to vector<2x64xf32>
    %101 = arith.addf %99, %100 : vector<2x64xf32>
    %102 = arith.negf %101 : vector<2x64xf32>
    %103 = math.exp %102 : vector<2x64xf32>
    %cst_24 = arith.constant 1.000000e+00 : f32
    %104 = vector.broadcast %cst_24 : f32 to vector<2x64xf32>
    %105 = arith.addf %104, %103 : vector<2x64xf32>
    %106 = arith.divf %104, %105 : vector<2x64xf32>
    %107 = vector.extract_strided_slice %106 {offsets = [0, 0], sizes = [2, 32], strides = [1, 1]} : vector<2x64xf32> to vector<2x32xf32>
    %108 = vector.extract_strided_slice %106 {offsets = [0, 32], sizes = [2, 32], strides = [1, 1]} : vector<2x64xf32> to vector<2x32xf32>
    %109 = vector.extract_strided_slice %98 {offsets = [0, 64], sizes = [2, 32], strides = [1, 1]} : vector<2x96xf32> to vector<2x32xf32>
    %110 = vector.extract_strided_slice %96 {offsets = [0, 64], sizes = [2, 32], strides = [1, 1]} : vector<2x96xf32> to vector<2x32xf32>
    %111 = arith.mulf %107, %110 : vector<2x32xf32>
    %112 = arith.addf %109, %111 : vector<2x32xf32>
    %113 = math.tanh %112 : vector<2x32xf32>
    %114 = arith.subf %92, %113 : vector<2x32xf32>
    %115 = arith.mulf %108, %114 : vector<2x32xf32>
    %116 = arith.addf %113, %115 : vector<2x32xf32>
    %117 = arith.truncf %116 : vector<2x32xf32> to vector<2x32xbf16>
    %cst_25 = arith.constant dense<0.000000e+00> : vector<2x96xf32>
    %118 = tpu.matmul %117, %2, %cst_25 {dimension_numbers = #tpu.dot_dimension_numbers<[1], [0], [0], [1], [0, 0, 1, 1], [], []>} : vector<2x32xbf16>, vector<32x96xbf16>, vector<2x96xf32> -> vector<2x96xf32>
    %119 = vector.broadcast %6 : vector<1x96xf32> to vector<2x96xf32>
    %120 = arith.addf %118, %119 : vector<2x96xf32>
    %121 = vector.extract_strided_slice %19 {offsets = [0, 4, 0], sizes = [2, 1, 96], strides = [1, 1, 1]} : vector<2x8x96xf32> to vector<2x1x96xf32>
    %122 = vector.shape_cast %121 : vector<2x1x96xf32> to vector<2x96xf32>
    %123 = vector.extract_strided_slice %122 {offsets = [0, 0], sizes = [2, 64], strides = [1, 1]} : vector<2x96xf32> to vector<2x64xf32>
    %124 = vector.extract_strided_slice %120 {offsets = [0, 0], sizes = [2, 64], strides = [1, 1]} : vector<2x96xf32> to vector<2x64xf32>
    %125 = arith.addf %123, %124 : vector<2x64xf32>
    %126 = arith.negf %125 : vector<2x64xf32>
    %127 = math.exp %126 : vector<2x64xf32>
    %cst_26 = arith.constant 1.000000e+00 : f32
    %128 = vector.broadcast %cst_26 : f32 to vector<2x64xf32>
    %129 = arith.addf %128, %127 : vector<2x64xf32>
    %130 = arith.divf %128, %129 : vector<2x64xf32>
    %131 = vector.extract_strided_slice %130 {offsets = [0, 0], sizes = [2, 32], strides = [1, 1]} : vector<2x64xf32> to vector<2x32xf32>
    %132 = vector.extract_strided_slice %130 {offsets = [0, 32], sizes = [2, 32], strides = [1, 1]} : vector<2x64xf32> to vector<2x32xf32>
    %133 = vector.extract_strided_slice %122 {offsets = [0, 64], sizes = [2, 32], strides = [1, 1]} : vector<2x96xf32> to vector<2x32xf32>
    %134 = vector.extract_strided_slice %120 {offsets = [0, 64], sizes = [2, 32], strides = [1, 1]} : vector<2x96xf32> to vector<2x32xf32>
    %135 = arith.mulf %131, %134 : vector<2x32xf32>
    %136 = arith.addf %133, %135 : vector<2x32xf32>
    %137 = math.tanh %136 : vector<2x32xf32>
    %138 = arith.subf %116, %137 : vector<2x32xf32>
    %139 = arith.mulf %132, %138 : vector<2x32xf32>
    %140 = arith.addf %137, %139 : vector<2x32xf32>
    %141 = arith.truncf %140 : vector<2x32xf32> to vector<2x32xbf16>
    %cst_27 = arith.constant dense<0.000000e+00> : vector<2x96xf32>
    %142 = tpu.matmul %141, %2, %cst_27 {dimension_numbers = #tpu.dot_dimension_numbers<[1], [0], [0], [1], [0, 0, 1, 1], [], []>} : vector<2x32xbf16>, vector<32x96xbf16>, vector<2x96xf32> -> vector<2x96xf32>
    %143 = vector.broadcast %6 : vector<1x96xf32> to vector<2x96xf32>
    %144 = arith.addf %142, %143 : vector<2x96xf32>
    %145 = vector.extract_strided_slice %19 {offsets = [0, 5, 0], sizes = [2, 1, 96], strides = [1, 1, 1]} : vector<2x8x96xf32> to vector<2x1x96xf32>
    %146 = vector.shape_cast %145 : vector<2x1x96xf32> to vector<2x96xf32>
    %147 = vector.extract_strided_slice %146 {offsets = [0, 0], sizes = [2, 64], strides = [1, 1]} : vector<2x96xf32> to vector<2x64xf32>
    %148 = vector.extract_strided_slice %144 {offsets = [0, 0], sizes = [2, 64], strides = [1, 1]} : vector<2x96xf32> to vector<2x64xf32>
    %149 = arith.addf %147, %148 : vector<2x64xf32>
    %150 = arith.negf %149 : vector<2x64xf32>
    %151 = math.exp %150 : vector<2x64xf32>
    %cst_28 = arith.constant 1.000000e+00 : f32
    %152 = vector.broadcast %cst_28 : f32 to vector<2x64xf32>
    %153 = arith.addf %152, %151 : vector<2x64xf32>
    %154 = arith.divf %152, %153 : vector<2x64xf32>
    %155 = vector.extract_strided_slice %154 {offsets = [0, 0], sizes = [2, 32], strides = [1, 1]} : vector<2x64xf32> to vector<2x32xf32>
    %156 = vector.extract_strided_slice %154 {offsets = [0, 32], sizes = [2, 32], strides = [1, 1]} : vector<2x64xf32> to vector<2x32xf32>
    %157 = vector.extract_strided_slice %146 {offsets = [0, 64], sizes = [2, 32], strides = [1, 1]} : vector<2x96xf32> to vector<2x32xf32>
    %158 = vector.extract_strided_slice %144 {offsets = [0, 64], sizes = [2, 32], strides = [1, 1]} : vector<2x96xf32> to vector<2x32xf32>
    %159 = arith.mulf %155, %158 : vector<2x32xf32>
    %160 = arith.addf %157, %159 : vector<2x32xf32>
    %161 = math.tanh %160 : vector<2x32xf32>
    %162 = arith.subf %140, %161 : vector<2x32xf32>
    %163 = arith.mulf %156, %162 : vector<2x32xf32>
    %164 = arith.addf %161, %163 : vector<2x32xf32>
    %165 = arith.truncf %164 : vector<2x32xf32> to vector<2x32xbf16>
    %cst_29 = arith.constant dense<0.000000e+00> : vector<2x96xf32>
    %166 = tpu.matmul %165, %2, %cst_29 {dimension_numbers = #tpu.dot_dimension_numbers<[1], [0], [0], [1], [0, 0, 1, 1], [], []>} : vector<2x32xbf16>, vector<32x96xbf16>, vector<2x96xf32> -> vector<2x96xf32>
    %167 = vector.broadcast %6 : vector<1x96xf32> to vector<2x96xf32>
    %168 = arith.addf %166, %167 : vector<2x96xf32>
    %169 = vector.extract_strided_slice %19 {offsets = [0, 6, 0], sizes = [2, 1, 96], strides = [1, 1, 1]} : vector<2x8x96xf32> to vector<2x1x96xf32>
    %170 = vector.shape_cast %169 : vector<2x1x96xf32> to vector<2x96xf32>
    %171 = vector.extract_strided_slice %170 {offsets = [0, 0], sizes = [2, 64], strides = [1, 1]} : vector<2x96xf32> to vector<2x64xf32>
    %172 = vector.extract_strided_slice %168 {offsets = [0, 0], sizes = [2, 64], strides = [1, 1]} : vector<2x96xf32> to vector<2x64xf32>
    %173 = arith.addf %171, %172 : vector<2x64xf32>
    %174 = arith.negf %173 : vector<2x64xf32>
    %175 = math.exp %174 : vector<2x64xf32>
    %cst_30 = arith.constant 1.000000e+00 : f32
    %176 = vector.broadcast %cst_30 : f32 to vector<2x64xf32>
    %177 = arith.addf %176, %175 : vector<2x64xf32>
    %178 = arith.divf %176, %177 : vector<2x64xf32>
    %179 = vector.extract_strided_slice %178 {offsets = [0, 0], sizes = [2, 32], strides = [1, 1]} : vector<2x64xf32> to vector<2x32xf32>
    %180 = vector.extract_strided_slice %178 {offsets = [0, 32], sizes = [2, 32], strides = [1, 1]} : vector<2x64xf32> to vector<2x32xf32>
    %181 = vector.extract_strided_slice %170 {offsets = [0, 64], sizes = [2, 32], strides = [1, 1]} : vector<2x96xf32> to vector<2x32xf32>
    %182 = vector.extract_strided_slice %168 {offsets = [0, 64], sizes = [2, 32], strides = [1, 1]} : vector<2x96xf32> to vector<2x32xf32>
    %183 = arith.mulf %179, %182 : vector<2x32xf32>
    %184 = arith.addf %181, %183 : vector<2x32xf32>
    %185 = math.tanh %184 : vector<2x32xf32>
    %186 = arith.subf %164, %185 : vector<2x32xf32>
    %187 = arith.mulf %180, %186 : vector<2x32xf32>
    %188 = arith.addf %185, %187 : vector<2x32xf32>
    %189 = arith.truncf %188 : vector<2x32xf32> to vector<2x32xbf16>
    %cst_31 = arith.constant dense<0.000000e+00> : vector<2x96xf32>
    %190 = tpu.matmul %189, %2, %cst_31 {dimension_numbers = #tpu.dot_dimension_numbers<[1], [0], [0], [1], [0, 0, 1, 1], [], []>} : vector<2x32xbf16>, vector<32x96xbf16>, vector<2x96xf32> -> vector<2x96xf32>
    %191 = vector.broadcast %6 : vector<1x96xf32> to vector<2x96xf32>
    %192 = arith.addf %190, %191 : vector<2x96xf32>
    %193 = vector.extract_strided_slice %19 {offsets = [0, 7, 0], sizes = [2, 1, 96], strides = [1, 1, 1]} : vector<2x8x96xf32> to vector<2x1x96xf32>
    %194 = vector.shape_cast %193 : vector<2x1x96xf32> to vector<2x96xf32>
    %195 = vector.extract_strided_slice %194 {offsets = [0, 0], sizes = [2, 64], strides = [1, 1]} : vector<2x96xf32> to vector<2x64xf32>
    %196 = vector.extract_strided_slice %192 {offsets = [0, 0], sizes = [2, 64], strides = [1, 1]} : vector<2x96xf32> to vector<2x64xf32>
    %197 = arith.addf %195, %196 : vector<2x64xf32>
    %198 = arith.negf %197 : vector<2x64xf32>
    %199 = math.exp %198 : vector<2x64xf32>
    %cst_32 = arith.constant 1.000000e+00 : f32
    %200 = vector.broadcast %cst_32 : f32 to vector<2x64xf32>
    %201 = arith.addf %200, %199 : vector<2x64xf32>
    %202 = arith.divf %200, %201 : vector<2x64xf32>
    %203 = vector.extract_strided_slice %202 {offsets = [0, 0], sizes = [2, 32], strides = [1, 1]} : vector<2x64xf32> to vector<2x32xf32>
    %204 = vector.extract_strided_slice %202 {offsets = [0, 32], sizes = [2, 32], strides = [1, 1]} : vector<2x64xf32> to vector<2x32xf32>
    %205 = vector.extract_strided_slice %194 {offsets = [0, 64], sizes = [2, 32], strides = [1, 1]} : vector<2x96xf32> to vector<2x32xf32>
    %206 = vector.extract_strided_slice %192 {offsets = [0, 64], sizes = [2, 32], strides = [1, 1]} : vector<2x96xf32> to vector<2x32xf32>
    %207 = arith.mulf %203, %206 : vector<2x32xf32>
    %208 = arith.addf %205, %207 : vector<2x32xf32>
    %209 = math.tanh %208 : vector<2x32xf32>
    %210 = arith.subf %188, %209 : vector<2x32xf32>
    %211 = arith.mulf %204, %210 : vector<2x32xf32>
    %212 = arith.addf %209, %211 : vector<2x32xf32>
    %213 = vector.shape_cast %44 : vector<2x32xf32> to vector<2x1x32xf32>
    %214 = vector.shape_cast %68 : vector<2x32xf32> to vector<2x1x32xf32>
    %215 = vector.shape_cast %92 : vector<2x32xf32> to vector<2x1x32xf32>
    %216 = vector.shape_cast %116 : vector<2x32xf32> to vector<2x1x32xf32>
    %217 = vector.shape_cast %140 : vector<2x32xf32> to vector<2x1x32xf32>
    %218 = vector.shape_cast %164 : vector<2x32xf32> to vector<2x1x32xf32>
    %219 = vector.shape_cast %188 : vector<2x32xf32> to vector<2x1x32xf32>
    %220 = vector.shape_cast %212 : vector<2x32xf32> to vector<2x1x32xf32>
    %221 = tpu.concatenate %213, %214, %215, %216, %217, %218, %219, %220 in 1 : vector<2x1x32xf32>, vector<2x1x32xf32>, vector<2x1x32xf32>, vector<2x1x32xf32>, vector<2x1x32xf32>, vector<2x1x32xf32>, vector<2x1x32xf32>, vector<2x1x32xf32> -> vector<2x8x32xf32>
    %222 = vector.shape_cast %221 : vector<2x8x32xf32> to vector<16x32xf32>
    %223 = arith.truncf %222 : vector<16x32xf32> to vector<16x32xbf16>
    %cst_33 = arith.constant dense<0.000000e+00> : vector<16x4xf32>
    %224 = tpu.matmul %223, %3, %cst_33 {dimension_numbers = #tpu.dot_dimension_numbers<[1], [0], [0], [1], [0, 0, 1, 1], [], []>} : vector<16x32xbf16>, vector<32x4xbf16>, vector<16x4xf32> -> vector<16x4xf32>
    %225 = vector.broadcast %7 : vector<1x4xf32> to vector<16x4xf32>
    %226 = arith.addf %224, %225 : vector<16x4xf32>
    %227 = vector.shape_cast %226 : vector<16x4xf32> to vector<2x8x4xf32>
    %c0_34 = arith.constant 0 : index
    %c0_35 = arith.constant 0 : index
    %c0_36 = arith.constant 0 : index
    %228 = vector.load %arg3[%c0_34, %c0_35, %c0_36] : memref<2x8x4xf32, #tpu.memory_space<vmem>>, vector<2x8x4xf32>
    tpu.vector_store %arg3[%c0_34, %c0_35, %c0_36], %227 {strides = array<i32>} : memref<2x8x4xf32, #tpu.memory_space<vmem>>, vector<2x8x4xf32>,
    return
  }
}

</mosaic_0001>

<bundles_post_ra>
// kernel: tpu_custom_call.1
= control target key start
LH: loop header
LB: loop body
LE: loop exit
PB: predicated region body
PF: predicated region fallthrough
CT: control target
= control target key end

     0   :  { %8 = vsyncpa [#allocation3], 0  ;;  %s1718_s0 = inlined_call_operand.hbm [shape: f32[2,8,32], index: 0, kind: input, shape index: {}]   ;;  %s1719_s1 = inlined_call_operand.hbm [shape: bf16[32,512], index: 1, kind: input, shape index: {}]   ;;  %s1720_s2 = inlined_call_operand.hbm [shape: f32[1,512], index: 2, kind: input, shape index: {}]   ;;  %s1721_s3 = inlined_call_operand.vmem [shape: f32[2,8,4], index: 3, kind: output, shape index: {}]  }
   0x1   :  { %9 = vsyncpa [#allocation5], 0  ;;  %s27_s14 = sshll.u32 %s1719_s1, 4  ;;  %s1451_s15 = smov [#allocation4]   ;;  %s28_s14 = int_to_ptr.hbm [resolvable:$true] %s27_s14 }
   0x2   :  { %s29_s16 = sshll.u32 %s1451_s15, 4  ;;  %s14_s19 = sshll.u32 %s1718_s0, 4  ;;  %s30_s16 = int_to_ptr.vmem [resolvable:$true] %s29_s16  ;;  %s15_s19 = int_to_ptr.hbm [resolvable:$true] %s14_s19 }
   0x3   :  { %s1452_s20 = smov 256   ;;  %s1453_s21 = smov 16  }
   0x4   :  { %35 = dma.hbm_to_vmem [thread:$0]  %s28_s14, 1024, %s30_s16, [#allocation5], %s1452_s20, %s1452_s20, %s1453_s21  }
   0x5   :  { %s1454_s22 = smov [#allocation2]   ;;  %s1455_s24 = smov 128  }
   0x6   :  { %s16_s23 = sshll.u32 %s1454_s22, 4  ;;  %s1456_s25 = smov 8   ;;  %s17_s23 = int_to_ptr.vmem [resolvable:$true] %s16_s23 }
   0x7   :  { %22 = dma.hbm_to_vmem [thread:$0]  %s15_s19, 256, %s17_s23, [#allocation3], %s1455_s24, %s1455_s24, %s1456_s25  }
   0x8   :  { %s41_s27 = sshll.u32 %s1720_s2, 4  ;;  %s1457_s28 = smov [#allocation6]   ;;  %s42_s27 = int_to_ptr.hbm [resolvable:$true] %s41_s27 }
   0x9   :  { %s43_s29 = sshll.u32 %s1457_s28, 4  ;;  %s44_s29 = int_to_ptr.vmem [resolvable:$true] %s43_s29 }
   0xa   :  { %46 = dma.hbm_to_vmem [thread:$0]  %s42_s27, 64, %s44_s29, [#allocation5]  }
   0xb   :  { %1447 = dma.done.wait [#allocation3], 256  }
   0xc   :  { %1448 = vsyncadd [#allocation3], 4294967040 }
   0xd   :  { %1449 = dma.done.wait [#allocation5], 1088  }
   0xe   :  { %1450 = vsyncadd [#allocation5], 4294966208  ;;  %v1199_v0 = vld [vmem:[#allocation4 + $0x20] sm:$0xf]  ;;  %v1252_v1 = vld [vmem:[#allocation4 + $0x2c] sm:$0xf0] }
   0xf   :  { %v1195_v2 = vld [vmem:[#allocation4] sm:$0xf]  ;;  %v1200_v3 = vor.u32 %v1252_v1, %v1199_v0  ;;  %v1251_v4 = vld [vmem:[#allocation4 + $0xc] sm:$0xf0]  ;;  %v1217_v6 = vld [vmem:[#allocation4 + $0x28] sm:$0xf] }
  0x10   :  { %v80_v5 = vld [vmem:[#allocation2] sm:$0xff]  ;;  %v1256_v7 = vld [vmem:[#allocation4 + $0x34] sm:$0xf0]  ;;  %v1213_v8 = vld [vmem:[#allocation4 + $0x8] sm:$0xf]  ;;  %v1196_v9 = vor.u32 %v1251_v4, %v1195_v2  ;;  %vm98_vm0 = vcmask 261120  }
  0x11   :  { %108 = vmatpush.bf16.msra.mxu0 %v1200_v3  ;;  %v81_v10 = vld [vmem:[#allocation2 + $0x8] sm:$0xff]  ;;  %v1218_v11 = vor.u32 %v1256_v7, %v1217_v6  ;;  %v1458_v15 = vmov 0   ;;  %v1208_v16 = vld [vmem:[#allocation4 + $0x24] sm:$0xf]  ;;  %v1254_v17 = vld [vmem:[#allocation4 + $0x30] sm:$0xf0] }
  0x12   :  { %v1255_v12 = vld [vmem:[#allocation4 + $0x14] sm:$0xf0]  ;;  %v82_v14 = vpack.c.bf16 %v81_v10, %v80_v5  ;;  %v1209_v18 = vor.u32 %v1254_v17, %v1208_v16  ;;  %v1204_v19 = vld [vmem:[#allocation4 + $0x4] sm:$0xf]  ;;  %v1253_v20 = vld [vmem:[#allocation4 + $0x10] sm:$0xf0] }
  0x13   :  { %175 = vmatpush.bf16.msra.mxu2 %v1218_v11  ;;  %v1214_v13 = vor.u32 %v1255_v12, %v1213_v8  ;;  %289 = vmatpush.bf16.msra.mxu3 %v1218_v11  ;;  %v1205_v21 = vor.u32 %v1253_v20, %v1204_v19  ;;  %v1270_v23 = vld [vmem:[#allocation6] ss:$0 sm:$0xff]  ;;  %v1492_v24 = vld [vmem:[#allocation6 + $0x2] ss:$0 sm:$0xff]  ;;  %s1459_s0 = smov 64   ;;  %s1460_s2 = smov 96  }
  0x14   :  { %143 = vmatpush.bf16.msra.mxu1 %v1209_v18  ;;  %v1272_v35 = vld [vmem:[#allocation6 + $0x1] ss:$0 sm:$0xff]  ;;  %s1461_s30 = smov 32   ;;  %vm275_vm9 = vcmask 1041409  }
  0x15   :  { %109 = vmatpush.bf16.msra.mxu0 %v1196_v9 }
  0x17   :  { %176 = vmatpush.bf16.msra.mxu2 %v1214_v13  ;;  %290 = vmatpush.bf16.msra.mxu3 %v1214_v13 }
  0x18   :  { %1201 = vmatmul.msk.bf16.vlgmr.msra.gmra.mxu0 %vm98_vm0, %v82_v14  ;;  %144 = vmatpush.bf16.msra.mxu1 %v1205_v21 }
  0x19   :  { %410 = vmatpush.bf16.msrb.mxu0 %v1218_v11 }
  0x1a   :  { %177 = vmatmul.bf16.vlgmr.msra.gmra.mxu2 %v1458_v15 }
  0x1b   :  { %656 = vmatpush.bf16.msrb.mxu2 %v1218_v11  ;;  %779 = vmatpush.bf16.msrb.mxu3 %v1218_v11 }
  0x1c   :  { %533 = vmatpush.bf16.msrb.mxu1 %v1218_v11 }
  0x1d   :  { %411 = vmatpush.bf16.msrb.mxu0 %v1214_v13 }
  0x1f   :  { %657 = vmatpush.bf16.msrb.mxu2 %v1214_v13  ;;  %780 = vmatpush.bf16.msrb.mxu3 %v1214_v13 }
  0x20   :  { %534 = vmatpush.bf16.msrb.mxu1 %v1214_v13 }
  0x21   :  { %902 = vmatpush.bf16.msra.mxu0 %v1218_v11 }
  0x25   :  { %903 = vmatpush.bf16.msra.mxu0 %v1214_v13 }
  0x95   :  { %v111_v22 = vpop.f32.mrf.mxu0 }
  0x96   :  { %v112_v25 = vadd.f32 %v1270_v23, %v111_v22 }
  0x98   :  { %1274 = vtanh.f32 %v112_v25 }
  0x9d   :  { %v113_v26 = vpop.f32.mrf.mxu0  ;;  %v178_v27 = vpop.f32.mrf.mxu2 }
  0x9e   :  { %v114_v28 = vadd.f32 %v1270_v23, %v113_v26  ;;  %v179_v29 = vadd.f32 %v1492_v24, %v178_v27  ;;  %v1275_v31 = vpop.eup %1274 }
  0xa0   :  { %1276 = vtanh.f32 %v114_v28  ;;  %v183_v30 = vrot.slane %v179_v29, 1 }
  0xa2   :  { %228 = vrot.lane.b32.xlu0 %v183_v30, %s1459_s0 }
  0xa5   :  { %v180_v32 = vpop.f32.mrf.mxu2 }
  0xa6   :  { %v1277_v33 = vpop.eup %1276 }
  0xa7   :  { %v118_v34 = vpack.c.bf16 %v1277_v33, %v1275_v31 }
  0xa9   :  { %1210 = vmatmul.msk.bf16.vlgmr.msra.gmra.mxu1 %vm98_vm0, %v118_v34 }
  0xaa   :  { %226 = vrot.lane.b32.xlu0 %v179_v29, %s1459_s0  ;;  %1025 = vmatpush.bf16.msra.mxu1 %v1218_v11 }
  0xae   :  { %1026 = vmatpush.bf16.msra.mxu1 %v1214_v13 }
 0x114   :  { %v229_v58 = vpop.permute.xlu0 %228 }
 0x11c   :  { %v227_v5 = vpop.permute.xlu0 %226 }
 0x126   :  { %v146_v36 = vpop.f32.mrf.mxu1 }
 0x127   :  { %v1498_v37 = vadd.f32 %v1272_v35, %v146_v36 }
 0x129   :  { %v186_v38 = vadd.f32 %v179_v29, %v1498_v37 }
 0x12b   :  { %v1219_v39 = vmul.f32 -1.442695, %v186_v38 }
 0x12d   :  { %1278 = vpow2.f32 %v1219_v39 }
 0x12e   :  { %v148_v40 = vpop.f32.mrf.mxu1 }
 0x12f   :  { %v1501_v41 = vadd.f32 %v1272_v35, %v148_v40 }
 0x131   :  { %v187_v42 = vadd.f32 %v183_v30, %v1501_v41 }
 0x133   :  { %v1279_v43 = vpop.eup %1278  ;;  %v1220_v44 = vmul.f32 -1.442695, %v187_v42 }
 0x134   :  { %v194_v45 = vadd.f32 1.0, %v1279_v43 }
 0x135   :  { %1280 = vpow2.f32 %v1220_v44 }
 0x136   :  { %1282 = vrcp.f32 %v194_v45  ;;  %v207_v0 = vand.u32 2147483648, %v194_v45  ;;  %vm201_vm6 = vweird.f32 %v194_v45  ;;  %v205_v2 = vand.u32 2147483647, %v194_v45 }
 0x138   :  { %v208_v4 = vor.u32 1.1754944e-38, %v207_v0  ;;  %vm206_vm8 = vcmp.eq.f32.partialorder %v205_v2, 8.507059e+37 }
 0x13b   :  { %v1281_v46 = vpop.eup %1280 }
 0x13c   :  { %v195_v47 = vadd.f32 1.0, %v1281_v46  ;;  %v1283_v48 = vpop.eup %1282 }
 0x13d   :  { %v197_v49 = vmul.f32 %v1283_v48, %v194_v45  ;;  %vm202_vm5 = vweird.f32 %v1283_v48 }
 0x13e   :  { %1284 = vrcp.f32 %v195_v47  ;;  %v222_v54 = vand.u32 2147483648, %v195_v47  ;;  %v220_v56 = vand.u32 2147483647, %v195_v47  ;;  %vm216_vm2 = vweird.f32 %v195_v47  ;;  %vm203_vm7 = vmor %vm201_vm6, %vm202_vm5 }
 0x13f   :  { %v198_v52 = vsub.f32 1.0, %v197_v49 }
 0x140   :  { %v223_v60 = vor.u32 1.1754944e-38, %v222_v54  ;;  %vm221_vm4 = vcmp.eq.f32.partialorder %v220_v56, 8.507059e+37 }
 0x141   :  { %v199_v57 = vmul.f32 %v1283_v48, %v198_v52 }
 0x143   :  { %v200_v62 = vadd.f32 %v1283_v48, %v199_v57 }
 0x144   :  { %v1285_v50 = vpop.eup %1284 }
 0x145   :  { %v212_v51 = vmul.f32 %v1285_v50, %v195_v47  ;;  %vm217_vm1 = vweird.f32 %v1285_v50  ;;  %v204_v3 = vsel %vm203_vm7, %v1283_v48, %v200_v62 }
 0x146   :  { %vm218_vm3 = vmor %vm216_vm2, %vm217_vm1  ;;  %v209_v6 = vsel %vm206_vm8, %v208_v4, %v204_v3 }
 0x147   :  { %v213_v53 = vsub.f32 1.0, %v212_v51  ;;  %v232_v7 = vmul.f32 %v227_v5, %v209_v6 }
 0x149   :  { %v214_v55 = vmul.f32 %v1285_v50, %v213_v53 }
 0x14b   :  { %v215_v59 = vadd.f32 %v1285_v50, %v214_v55 }
 0x14d   :  { %v219_v61 = vsel %vm218_vm3, %v1285_v50, %v215_v59 }
 0x14e   :  { %v224_v63 = vsel %vm221_vm4, %v223_v60, %v219_v61 }
 0x14f   :  { %v233_v1 = vmul.f32 %v229_v58, %v224_v63 }
 0x151   :  { %238 = vrot.lane.b32.xlu1 %v233_v1, %s1459_s0 }
 0x159   :  { %236 = vrot.lane.b32.xlu1 %v232_v7, %s1459_s0 }
 0x1c3   :  { %v239_v8 = vpop.permute.xlu1 %238 }
 0x1c4   :  { %v243_v9 = vadd.f32 %v239_v8, %v1501_v41 }
 0x1c6   :  { %1286 = vtanh.f32 %v243_v9 }
 0x1cb   :  { %v237_v10 = vpop.permute.xlu1 %236 }
 0x1cc   :  { %v1287_v11 = vpop.eup %1286  ;;  %v242_v12 = vadd.f32 %v237_v10, %v1498_v37 }
 0x1cd   :  { %v247_v13 = vsub.f32 0.0, %v1287_v11 }
 0x1ce   :  { %1288 = vtanh.f32 %v242_v12 }
 0x1cf   :  { %252 = vrot.lane.b32.xlu2 %v247_v13, %s1460_s2 }
 0x1d4   :  { %v1289_v14 = vpop.eup %1288 }
 0x1d5   :  { %v246_v15 = vsub.f32 0.0, %v1289_v14 }
 0x1d7   :  { %250 = vrot.lane.b32.xlu2 %v246_v15, %s1460_s2 }
 0x229   :  { %v253_v16 = vpop.permute.xlu2 %252 }
 0x22a   :  { %v257_v17 = vmul.f32 %v253_v16, %v224_v63 }
 0x22c   :  { %262 = vrot.lane.b32.xlu0 %v257_v17, %s1461_s30 }
 0x231   :  { %v251_v18 = vpop.permute.xlu2 %250 }
 0x232   :  { %v256_v19 = vmul.f32 %v251_v18, %v209_v6 }
 0x234   :  { %260 = vrot.lane.b32.xlu1 %v256_v19, %s1461_s30 }
 0x29e   :  { %v263_v20 = vpop.permute.xlu0 %262 }
 0x29f   :  { %v1512_v21 = vadd.f32 %v1287_v11, %v263_v20 }
 0x2a1   :  { %v269_v22 = vpack.c.bf16 %v1512_v21, %v1512_v21 }
 0x2a3   :  { %v273_v25 = vunpack.c.l.b16 %v269_v22 }
 0x2a5   :  { %v274_v28 = vrot.slane %v273_v25, 7 }
 0x2a6   :  { %v261_v23 = vpop.permute.xlu1 %260 }
 0x2a7   :  { %v1516_v26 = vadd.f32 %v1289_v14, %v261_v23 }
 0x2a9   :  { %v268_v27 = vpack.c.bf16 %v1516_v26, %v1516_v26 }
 0x2ab   :  { %v272_v29 = vunpack.c.l.b16 %v268_v27 }
 0x2ad   :  { %v276_v30 = vsel %vm275_vm9, %v274_v28, %v272_v29 }
 0x2ae   :  { %v277_v31 = vpack.c.b16 %v276_v30, %v276_v30 }
 0x2b0   :  { %278 = vrot.lane.b32.xlu2 %v277_v31, %s1459_s0 }
 0x30a   :  { %v279_v32 = vpop.permute.xlu2 %278 }
 0x30b   :  { %1221 = vmatmul.msk.bf16.vlgmr.msra.gmra.mxu3 %vm98_vm0, %v279_v32 }
 0x38e   :  { %v292_v33 = vpop.f32.mrf.mxu3 }
 0x38f   :  { %v293_v34 = vadd.f32 %v1492_v24, %v292_v33 }
 0x391   :  { %342 = vrot.lane.b32.xlu1 %v293_v34, %s1459_s0  ;;  %v297_v35 = vrot.slane %v293_v34, 7  ;;  %v301_v38 = vadd.f32 %v293_v34, %v1501_v41 }
 0x393   :  { %340 = vrot.lane.b32.xlu0 %v297_v35, %s1459_s0  ;;  %v300_v39 = vadd.f32 %v297_v35, %v1498_v37  ;;  %v1223_v40 = vmul.f32 -1.442695, %v301_v38 }
 0x395   :  { %v1222_v42 = vmul.f32 -1.442695, %v300_v39  ;;  %1290 = vpow2.f32 %v1223_v40 }
 0x396   :  { %v294_v36 = vpop.f32.mrf.mxu3 }
 0x397   :  { %1292 = vpow2.f32 %v1222_v42 }
 0x39b   :  { %v1291_v43 = vpop.eup %1290 }
 0x39c   :  { %v309_v45 = vadd.f32 1.0, %v1291_v43 }
 0x39d   :  { %v1293_v44 = vpop.eup %1292 }
 0x39e   :  { %v308_v46 = vadd.f32 1.0, %v1293_v44  ;;  %1294 = vrcp.f32 %v309_v45  ;;  %v336_v56 = vand.u32 2147483648, %v309_v45  ;;  %vm330_vm11 = vweird.f32 %v309_v45 }
 0x39f   :  { %v334_v57 = vand.u32 2147483647, %v309_v45 }
 0x3a0   :  { %1296 = vrcp.f32 %v308_v46  ;;  %v321_v59 = vand.u32 2147483648, %v308_v46  ;;  %vm315_vm14 = vweird.f32 %v308_v46  ;;  %v319_v61 = vand.u32 2147483647, %v308_v46 }
 0x3a1   :  { %v337_v62 = vor.u32 1.1754944e-38, %v336_v56  ;;  %vm335_vm1 = vcmp.eq.f32.partialorder %v334_v57, 8.507059e+37 }
 0x3a2   :  { %v322_v2 = vor.u32 1.1754944e-38, %v321_v59  ;;  %vm320_vm2 = vcmp.eq.f32.partialorder %v319_v61, 8.507059e+37 }
 0x3a4   :  { %v1295_v47 = vpop.eup %1294 }
 0x3a5   :  { %v326_v49 = vmul.f32 %v1295_v47, %v309_v45  ;;  %vm331_vm10 = vweird.f32 %v1295_v47 }
 0x3a6   :  { %v1297_v48 = vpop.eup %1296  ;;  %vm332_vm13 = vmor %vm330_vm11, %vm331_vm10 }
 0x3a7   :  { %v311_v50 = vmul.f32 %v1297_v48, %v308_v46  ;;  %v327_v51 = vsub.f32 1.0, %v326_v49  ;;  %vm316_vm12 = vweird.f32 %v1297_v48 }
 0x3a8   :  { %vm317_vm15 = vmor %vm315_vm14, %vm316_vm12 }
 0x3a9   :  { %v312_v52 = vsub.f32 1.0, %v311_v50  ;;  %v328_v53 = vmul.f32 %v1295_v47, %v327_v51 }
 0x3ab   :  { %v313_v54 = vmul.f32 %v1297_v48, %v312_v52  ;;  %v329_v55 = vadd.f32 %v1295_v47, %v328_v53 }
 0x3ad   :  { %v314_v58 = vadd.f32 %v1297_v48, %v313_v54  ;;  %v333_v60 = vsel %vm332_vm13, %v1295_v47, %v329_v55 }
 0x3ae   :  { %v338_v1 = vsel %vm335_vm1, %v337_v62, %v333_v60 }
 0x3af   :  { %v318_v63 = vsel %vm317_vm15, %v1297_v48, %v314_v58 }
 0x3b0   :  { %v323_v5 = vsel %vm320_vm2, %v322_v2, %v318_v63 }
 0x403   :  { %v343_v0 = vpop.permute.xlu1 %342 }
 0x404   :  { %v347_v3 = vmul.f32 %v343_v0, %v338_v1 }
 0x405   :  { %v341_v4 = vpop.permute.xlu0 %340 }
 0x406   :  { %v346_v6 = vmul.f32 %v341_v4, %v323_v5  ;;  %352 = vrot.lane.b32.xlu0 %v347_v3, %s1459_s0 }
 0x408   :  { %350 = vrot.lane.b32.xlu2 %v346_v6, %s1459_s0 }
 0x462   :  { %v351_v7 = vpop.permute.xlu2 %350 }
 0x463   :  { %v356_v8 = vadd.f32 %v351_v7, %v1498_v37 }
 0x465   :  { %1298 = vtanh.f32 %v356_v8 }
 0x46b   :  { %v1299_v9 = vpop.eup %1298 }
 0x46c   :  { %v362_v10 = vrot.slane %v1299_v9, 1 }
 0x46e   :  { %v366_v11 = vsub.f32 %v1516_v26, %v362_v10 }
 0x470   :  { %v370_v12 = vrot.slane %v366_v11, 7 }
 0x472   :  { %372 = vrot.lane.b32.xlu1 %v370_v12, %s1460_s2 }
 0x478   :  { %v353_v13 = vpop.permute.xlu0 %352 }
 0x479   :  { %v357_v14 = vadd.f32 %v353_v13, %v1501_v41 }
 0x47b   :  { %1300 = vtanh.f32 %v357_v14 }
 0x481   :  { %v1301_v15 = vpop.eup %1300 }
 0x482   :  { %v363_v16 = vrot.slane %v1301_v15, 1 }
 0x484   :  { %v367_v17 = vsub.f32 %v1512_v21, %v363_v16 }
 0x486   :  { %v371_v18 = vrot.slane %v367_v17, 7 }
 0x488   :  { %374 = vrot.lane.b32.xlu2 %v371_v18, %s1460_s2 }
 0x4e2   :  { %v375_v19 = vpop.permute.xlu2 %374 }
 0x4e3   :  { %v379_v20 = vmul.f32 %v375_v19, %v338_v1 }
 0x4e4   :  { %v373_v22 = vpop.permute.xlu1 %372 }
 0x4e5   :  { %v378_v23 = vmul.f32 %v373_v22, %v323_v5  ;;  %384 = vrot.lane.b32.xlu1 %v379_v20, %s1461_s30 }
 0x4e7   :  { %382 = vrot.lane.b32.xlu0 %v378_v23, %s1461_s30 }
 0x557   :  { %v385_v25 = vpop.permute.xlu1 %384 }
 0x558   :  { %v1538_v27 = vadd.f32 %v1301_v15, %v385_v25 }
 0x559   :  { %v383_v28 = vpop.permute.xlu0 %382 }
 0x55a   :  { %v1540_v29 = vadd.f32 %v1299_v9, %v383_v28  ;;  %v391_v30 = vpack.c.bf16 %v1538_v27, %v1538_v27 }
 0x55c   :  { %v390_v31 = vpack.c.bf16 %v1540_v29, %v1540_v29  ;;  %v395_v33 = vunpack.c.l.b16 %v391_v30 }
 0x55e   :  { %v394_v32 = vunpack.c.l.b16 %v390_v31 }
 0x560   :  { %v396_v34 = vrot.slane %v394_v32, 1 }
 0x562   :  { %v397_v35 = vsel %vm275_vm9, %v395_v33, %v396_v34 }
 0x563   :  { %v398_v36 = vpack.c.b16 %v397_v35, %v397_v35 }
 0x565   :  { %399 = vrot.lane.b32.xlu2 %v398_v36, %s1459_s0 }
 0x5bf   :  { %v400_v38 = vpop.permute.xlu2 %399 }
 0x5c0   :  { %1224 = vmatmul.msk.bf16.vlgmr.msrb.gmra.mxu0 %vm98_vm0, %v400_v38 }
 0x63d   :  { %v413_v39 = vpop.f32.mrf.mxu0 }
 0x63e   :  { %v414_v40 = vadd.f32 %v1492_v24, %v413_v39 }
 0x640   :  { %v418_v42 = vrot.slane %v414_v40, 6  ;;  %v419_v43 = vrot.slane %v414_v40, 7 }
 0x642   :  { %464 = vrot.lane.b32.xlu1 %v419_v43, %s1459_s0  ;;  %462 = vrot.lane.b32.xlu0 %v418_v42, %s1459_s0  ;;  %v422_v45 = vadd.f32 %v418_v42, %v1498_v37  ;;  %v423_v46 = vadd.f32 %v419_v43, %v1501_v41 }
 0x644   :  { %v1225_v47 = vmul.f32 -1.442695, %v422_v45  ;;  %v1226_v48 = vmul.f32 -1.442695, %v423_v46 }
 0x645   :  { %v415_v44 = vpop.f32.mrf.mxu0 }
 0x646   :  { %1302 = vpow2.f32 %v1225_v47 }
 0x647   :  { %1304 = vpow2.f32 %v1226_v48 }
 0x64c   :  { %v1303_v49 = vpop.eup %1302 }
 0x64d   :  { %v1305_v50 = vpop.eup %1304  ;;  %v430_v51 = vadd.f32 1.0, %v1303_v49 }
 0x64e   :  { %v431_v52 = vadd.f32 1.0, %v1305_v50 }
 0x64f   :  { %1306 = vrcp.f32 %v430_v51  ;;  %vm437_vm5 = vweird.f32 %v430_v51  ;;  %v443_v0 = vand.u32 2147483648, %v430_v51  ;;  %v441_v2 = vand.u32 2147483647, %v430_v51 }
 0x650   :  { %1308 = vrcp.f32 %v431_v52  ;;  %v458_v63 = vand.u32 2147483648, %v431_v52  ;;  %vm452_vm6 = vweird.f32 %v431_v52  ;;  %v456_v1 = vand.u32 2147483647, %v431_v52 }
 0x651   :  { %v444_v6 = vor.u32 1.1754944e-38, %v443_v0  ;;  %vm442_vm11 = vcmp.eq.f32.partialorder %v441_v2, 8.507059e+37 }
 0x652   :  { %v459_v5 = vor.u32 1.1754944e-38, %v458_v63  ;;  %vm457_vm10 = vcmp.eq.f32.partialorder %v456_v1, 8.507059e+37 }
 0x655   :  { %v1307_v53 = vpop.eup %1306 }
 0x656   :  { %v1309_v54 = vpop.eup %1308  ;;  %v433_v56 = vmul.f32 %v1307_v53, %v430_v51  ;;  %vm438_vm3 = vweird.f32 %v1307_v53 }
 0x657   :  { %v448_v55 = vmul.f32 %v1309_v54, %v431_v52  ;;  %vm453_vm4 = vweird.f32 %v1309_v54  ;;  %vm439_vm7 = vmor %vm437_vm5, %vm438_vm3 }
 0x658   :  { %v434_v58 = vsub.f32 1.0, %v433_v56  ;;  %vm454_vm8 = vmor %vm452_vm6, %vm453_vm4 }
 0x659   :  { %v449_v57 = vsub.f32 1.0, %v448_v55 }
 0x65a   :  { %v435_v60 = vmul.f32 %v1307_v53, %v434_v58 }
 0x65b   :  { %v450_v59 = vmul.f32 %v1309_v54, %v449_v57 }
 0x65c   :  { %v436_v62 = vadd.f32 %v1307_v53, %v435_v60 }
 0x65d   :  { %v451_v61 = vadd.f32 %v1309_v54, %v450_v59 }
 0x65e   :  { %v440_v4 = vsel %vm439_vm7, %v1307_v53, %v436_v62 }
 0x65f   :  { %v455_v3 = vsel %vm454_vm8, %v1309_v54, %v451_v61  ;;  %v445_v10 = vsel %vm442_vm11, %v444_v6, %v440_v4 }
 0x660   :  { %v460_v8 = vsel %vm457_vm10, %v459_v5, %v455_v3 }
 0x6b4   :  { %v465_v7 = vpop.permute.xlu1 %464  ;;  %v463_v9 = vpop.permute.xlu0 %462 }
 0x6b5   :  { %v469_v11 = vmul.f32 %v465_v7, %v460_v8  ;;  %v468_v12 = vmul.f32 %v463_v9, %v445_v10 }
 0x6b7   :  { %474 = vrot.lane.b32.xlu0 %v469_v11, %s1459_s0  ;;  %472 = vrot.lane.b32.xlu2 %v468_v12, %s1459_s0 }
 0x711   :  { %v473_v13 = vpop.permute.xlu2 %472 }
 0x712   :  { %v478_v14 = vadd.f32 %v473_v13, %v1498_v37 }
 0x714   :  { %1310 = vtanh.f32 %v478_v14 }
 0x71a   :  { %v1311_v15 = vpop.eup %1310 }
 0x71b   :  { %v484_v16 = vrot.slane %v1311_v15, 1 }
 0x71d   :  { %v488_v17 = vsub.f32 %v1540_v29, %v484_v16 }
 0x71f   :  { %v492_v18 = vrot.slane %v488_v17, 7 }
 0x721   :  { %494 = vrot.lane.b32.xlu1 %v492_v18, %s1460_s2 }
 0x729   :  { %v475_v19 = vpop.permute.xlu0 %474 }
 0x72a   :  { %v479_v20 = vadd.f32 %v475_v19, %v1501_v41 }
 0x72c   :  { %1312 = vtanh.f32 %v479_v20 }
 0x732   :  { %v1313_v22 = vpop.eup %1312 }
 0x733   :  { %v485_v23 = vrot.slane %v1313_v22, 1 }
 0x735   :  { %v489_v25 = vsub.f32 %v1538_v27, %v485_v23 }
 0x737   :  { %v493_v28 = vrot.slane %v489_v25, 7 }
 0x739   :  { %496 = vrot.lane.b32.xlu2 %v493_v28, %s1460_s2 }
 0x793   :  { %v495_v30 = vpop.permute.xlu1 %494  ;;  %v497_v31 = vpop.permute.xlu2 %496 }
 0x794   :  { %v500_v32 = vmul.f32 %v495_v30, %v445_v10  ;;  %v501_v33 = vmul.f32 %v497_v31, %v460_v8 }
 0x796   :  { %504 = vrot.lane.b32.xlu0 %v500_v32, %s1461_s30  ;;  %506 = vrot.lane.b32.xlu1 %v501_v33, %s1461_s30 }
 0x808   :  { %v505_v34 = vpop.permute.xlu0 %504  ;;  %v507_v35 = vpop.permute.xlu1 %506 }
 0x809   :  { %v1564_v36 = vadd.f32 %v1311_v15, %v505_v34  ;;  %v1566_v38 = vadd.f32 %v1313_v22, %v507_v35 }
 0x80b   :  { %v512_v39 = vpack.c.bf16 %v1564_v36, %v1564_v36  ;;  %v513_v40 = vpack.c.bf16 %v1566_v38, %v1566_v38 }
 0x80d   :  { %v516_v42 = vunpack.c.l.b16 %v512_v39  ;;  %v517_v43 = vunpack.c.l.b16 %v513_v40 }
 0x80f   :  { %v518_v44 = vrot.slane %v516_v42, 2  ;;  %v519_v45 = vrot.slane %v517_v43, 1 }
 0x811   :  { %v520_v46 = vsel %vm275_vm9, %v519_v45, %v518_v44 }
 0x812   :  { %v521_v47 = vpack.c.b16 %v520_v46, %v520_v46 }
 0x814   :  { %522 = vrot.lane.b32.xlu2 %v521_v47, %s1459_s0 }
 0x86e   :  { %v523_v48 = vpop.permute.xlu2 %522 }
 0x86f   :  { %1227 = vmatmul.msk.bf16.vlgmr.msrb.gmra.mxu1 %vm98_vm0, %v523_v48 }
 0x8ec   :  { %v536_v49 = vpop.f32.mrf.mxu1 }
 0x8ed   :  { %v537_v50 = vadd.f32 %v1492_v24, %v536_v49 }
 0x8ef   :  { %v541_v51 = vrot.slane %v537_v50, 5  ;;  %v542_v52 = vrot.slane %v537_v50, 6 }
 0x8f1   :  { %587 = vrot.lane.b32.xlu1 %v542_v52, %s1459_s0  ;;  %585 = vrot.lane.b32.xlu0 %v541_v51, %s1459_s0  ;;  %v545_v54 = vadd.f32 %v541_v51, %v1498_v37  ;;  %v546_v55 = vadd.f32 %v542_v52, %v1501_v41 }
 0x8f3   :  { %v1228_v56 = vmul.f32 -1.442695, %v545_v54  ;;  %v1229_v57 = vmul.f32 -1.442695, %v546_v55 }
 0x8f4   :  { %v538_v53 = vpop.f32.mrf.mxu1 }
 0x8f5   :  { %1314 = vpow2.f32 %v1228_v56 }
 0x8f6   :  { %1316 = vpow2.f32 %v1229_v57 }
 0x8fb   :  { %v1315_v58 = vpop.eup %1314 }
 0x8fc   :  { %v1317_v59 = vpop.eup %1316  ;;  %v553_v60 = vadd.f32 1.0, %v1315_v58 }
 0x8fd   :  { %v554_v61 = vadd.f32 1.0, %v1317_v59 }
 0x8fe   :  { %1318 = vrcp.f32 %v553_v60  ;;  %vm560_vm14 = vweird.f32 %v553_v60  ;;  %v566_v9 = vand.u32 2147483648, %v553_v60  ;;  %v564_v11 = vand.u32 2147483647, %v553_v60 }
 0x8ff   :  { %1320 = vrcp.f32 %v554_v61  ;;  %v581_v8 = vand.u32 2147483648, %v554_v61  ;;  %vm575_vm15 = vweird.f32 %v554_v61  ;;  %v579_v10 = vand.u32 2147483647, %v554_v61 }
 0x900   :  { %v567_v15 = vor.u32 1.1754944e-38, %v566_v9  ;;  %vm565_vm4 = vcmp.eq.f32.partialorder %v564_v11, 8.507059e+37 }
 0x901   :  { %v582_v14 = vor.u32 1.1754944e-38, %v581_v8  ;;  %vm580_vm3 = vcmp.eq.f32.partialorder %v579_v10, 8.507059e+37 }
 0x904   :  { %v1319_v62 = vpop.eup %1318 }
 0x905   :  { %v1321_v63 = vpop.eup %1320  ;;  %v556_v1 = vmul.f32 %v1319_v62, %v553_v60  ;;  %vm561_vm12 = vweird.f32 %v1319_v62 }
 0x906   :  { %v571_v0 = vmul.f32 %v1321_v63, %v554_v61  ;;  %vm576_vm13 = vweird.f32 %v1321_v63  ;;  %vm562_vm1 = vmor %vm560_vm14, %vm561_vm12 }
 0x907   :  { %v557_v3 = vsub.f32 1.0, %v556_v1  ;;  %vm577_vm2 = vmor %vm575_vm15, %vm576_vm13 }
 0x908   :  { %v572_v2 = vsub.f32 1.0, %v571_v0 }
 0x909   :  { %v558_v5 = vmul.f32 %v1319_v62, %v557_v3 }
 0x90a   :  { %v573_v4 = vmul.f32 %v1321_v63, %v572_v2 }
 0x90b   :  { %v559_v7 = vadd.f32 %v1319_v62, %v558_v5 }
 0x90c   :  { %v574_v6 = vadd.f32 %v1321_v63, %v573_v4 }
 0x90d   :  { %v563_v13 = vsel %vm562_vm1, %v1319_v62, %v559_v7 }
 0x90e   :  { %v578_v12 = vsel %vm577_vm2, %v1321_v63, %v574_v6  ;;  %v568_v19 = vsel %vm565_vm4, %v567_v15, %v563_v13 }
 0x90f   :  { %v583_v17 = vsel %vm580_vm3, %v582_v14, %v578_v12 }
 0x963   :  { %v588_v16 = vpop.permute.xlu1 %587  ;;  %v586_v18 = vpop.permute.xlu0 %585 }
 0x964   :  { %v592_v20 = vmul.f32 %v588_v16, %v583_v17  ;;  %v591_v22 = vmul.f32 %v586_v18, %v568_v19 }
 0x966   :  { %597 = vrot.lane.b32.xlu0 %v592_v20, %s1459_s0  ;;  %595 = vrot.lane.b32.xlu2 %v591_v22, %s1459_s0 }
 0x9c0   :  { %v596_v23 = vpop.permute.xlu2 %595 }
 0x9c1   :  { %v601_v25 = vadd.f32 %v596_v23, %v1498_v37 }
 0x9c3   :  { %1322 = vtanh.f32 %v601_v25 }
 0x9c9   :  { %v1323_v28 = vpop.eup %1322 }
 0x9ca   :  { %v607_v30 = vrot.slane %v1323_v28, 1 }
 0x9cc   :  { %v611_v31 = vsub.f32 %v1564_v36, %v607_v30 }
 0x9ce   :  { %v615_v32 = vrot.slane %v611_v31, 7 }
 0x9d0   :  { %617 = vrot.lane.b32.xlu1 %v615_v32, %s1460_s2 }
 0x9d8   :  { %v598_v33 = vpop.permute.xlu0 %597 }
 0x9d9   :  { %v602_v34 = vadd.f32 %v598_v33, %v1501_v41 }
 0x9db   :  { %1324 = vtanh.f32 %v602_v34 }
 0x9e1   :  { %v1325_v35 = vpop.eup %1324 }
 0x9e2   :  { %v608_v39 = vrot.slane %v1325_v35, 1 }
 0x9e4   :  { %v612_v40 = vsub.f32 %v1566_v38, %v608_v39 }
 0x9e6   :  { %v616_v42 = vrot.slane %v612_v40, 7 }
 0x9e8   :  { %619 = vrot.lane.b32.xlu2 %v616_v42, %s1460_s2 }
 0xa42   :  { %v618_v43 = vpop.permute.xlu1 %617  ;;  %v620_v44 = vpop.permute.xlu2 %619 }
 0xa43   :  { %v623_v45 = vmul.f32 %v618_v43, %v568_v19  ;;  %v624_v46 = vmul.f32 %v620_v44, %v583_v17 }
 0xa45   :  { %627 = vrot.lane.b32.xlu0 %v623_v45, %s1461_s30  ;;  %629 = vrot.lane.b32.xlu1 %v624_v46, %s1461_s30 }
 0xab7   :  { %v628_v47 = vpop.permute.xlu0 %627  ;;  %v630_v48 = vpop.permute.xlu1 %629 }
 0xab8   :  { %v1590_v49 = vadd.f32 %v1323_v28, %v628_v47  ;;  %v1592_v50 = vadd.f32 %v1325_v35, %v630_v48 }
 0xaba   :  { %v635_v51 = vpack.c.bf16 %v1590_v49, %v1590_v49  ;;  %v636_v52 = vpack.c.bf16 %v1592_v50, %v1592_v50 }
 0xabc   :  { %v639_v53 = vunpack.c.l.b16 %v635_v51  ;;  %v640_v54 = vunpack.c.l.b16 %v636_v52 }
 0xabe   :  { %v641_v55 = vrot.slane %v639_v53, 3  ;;  %v642_v56 = vrot.slane %v640_v54, 2 }
 0xac0   :  { %v643_v57 = vsel %vm275_vm9, %v642_v56, %v641_v55 }
 0xac1   :  { %v644_v58 = vpack.c.b16 %v643_v57, %v643_v57 }
 0xac3   :  { %645 = vrot.lane.b32.xlu2 %v644_v58, %s1459_s0 }
 0xb1d   :  { %v646_v59 = vpop.permute.xlu2 %645 }
 0xb1e   :  { %1230 = vmatmul.msk.bf16.vlgmr.msrb.gmra.mxu2 %vm98_vm0, %v646_v59 }
 0xba1   :  { %v659_v60 = vpop.f32.mrf.mxu2 }
 0xba2   :  { %v660_v61 = vadd.f32 %v1492_v24, %v659_v60 }
 0xba4   :  { %v664_v62 = vrot.slane %v660_v61, 4  ;;  %v665_v63 = vrot.slane %v660_v61, 5 }
 0xba6   :  { %710 = vrot.lane.b32.xlu1 %v665_v63, %s1459_s0  ;;  %708 = vrot.lane.b32.xlu0 %v664_v62, %s1459_s0  ;;  %v668_v1 = vadd.f32 %v664_v62, %v1498_v37  ;;  %v669_v2 = vadd.f32 %v665_v63, %v1501_v41 }
 0xba8   :  { %v1231_v3 = vmul.f32 -1.442695, %v668_v1  ;;  %v1232_v4 = vmul.f32 -1.442695, %v669_v2 }
 0xba9   :  { %v661_v0 = vpop.f32.mrf.mxu2 }
 0xbaa   :  { %1326 = vpow2.f32 %v1231_v3 }
 0xbab   :  { %1328 = vpow2.f32 %v1232_v4 }
 0xbb0   :  { %v1327_v5 = vpop.eup %1326 }
 0xbb1   :  { %v1329_v6 = vpop.eup %1328  ;;  %v676_v7 = vadd.f32 1.0, %v1327_v5 }
 0xbb2   :  { %v677_v8 = vadd.f32 1.0, %v1329_v6 }
 0xbb3   :  { %1330 = vrcp.f32 %v676_v7  ;;  %vm683_vm7 = vweird.f32 %v676_v7  ;;  %v689_v20 = vand.u32 2147483648, %v676_v7  ;;  %v687_v23 = vand.u32 2147483647, %v676_v7 }
 0xbb4   :  { %1332 = vrcp.f32 %v677_v8  ;;  %v704_v19 = vand.u32 2147483648, %v677_v8  ;;  %vm698_vm8 = vweird.f32 %v677_v8  ;;  %v702_v22 = vand.u32 2147483647, %v677_v8 }
 0xbb5   :  { %v690_v31 = vor.u32 1.1754944e-38, %v689_v20  ;;  %vm688_vm13 = vcmp.eq.f32.partialorder %v687_v23, 8.507059e+37 }
 0xbb6   :  { %v705_v30 = vor.u32 1.1754944e-38, %v704_v19  ;;  %vm703_vm12 = vcmp.eq.f32.partialorder %v702_v22, 8.507059e+37 }
 0xbb9   :  { %v1331_v9 = vpop.eup %1330 }
 0xbba   :  { %v1333_v10 = vpop.eup %1332  ;;  %v679_v12 = vmul.f32 %v1331_v9, %v676_v7  ;;  %vm684_vm5 = vweird.f32 %v1331_v9 }
 0xbbb   :  { %v694_v11 = vmul.f32 %v1333_v10, %v677_v8  ;;  %vm699_vm6 = vweird.f32 %v1333_v10  ;;  %vm685_vm10 = vmor %vm683_vm7, %vm684_vm5 }
 0xbbc   :  { %v680_v14 = vsub.f32 1.0, %v679_v12  ;;  %vm700_vm11 = vmor %vm698_vm8, %vm699_vm6 }
 0xbbd   :  { %v695_v13 = vsub.f32 1.0, %v694_v11 }
 0xbbe   :  { %v681_v16 = vmul.f32 %v1331_v9, %v680_v14 }
 0xbbf   :  { %v696_v15 = vmul.f32 %v1333_v10, %v695_v13 }
 0xbc0   :  { %v682_v18 = vadd.f32 %v1331_v9, %v681_v16 }
 0xbc1   :  { %v697_v17 = vadd.f32 %v1333_v10, %v696_v15 }
 0xbc2   :  { %v686_v28 = vsel %vm685_vm10, %v1331_v9, %v682_v18 }
 0xbc3   :  { %v701_v25 = vsel %vm700_vm11, %v1333_v10, %v697_v17  ;;  %v691_v35 = vsel %vm688_vm13, %v690_v31, %v686_v28 }
 0xbc4   :  { %v706_v33 = vsel %vm703_vm12, %v705_v30, %v701_v25 }
 0xc18   :  { %v711_v32 = vpop.permute.xlu1 %710  ;;  %v709_v34 = vpop.permute.xlu0 %708 }
 0xc19   :  { %v715_v39 = vmul.f32 %v711_v32, %v706_v33  ;;  %v714_v40 = vmul.f32 %v709_v34, %v691_v35 }
 0xc1b   :  { %720 = vrot.lane.b32.xlu0 %v715_v39, %s1459_s0  ;;  %718 = vrot.lane.b32.xlu2 %v714_v40, %s1459_s0 }
 0xc75   :  { %v719_v42 = vpop.permute.xlu2 %718 }
 0xc76   :  { %v724_v43 = vadd.f32 %v719_v42, %v1498_v37 }
 0xc78   :  { %1334 = vtanh.f32 %v724_v43 }
 0xc7e   :  { %v1335_v44 = vpop.eup %1334 }
 0xc7f   :  { %v730_v45 = vrot.slane %v1335_v44, 1 }
 0xc81   :  { %v734_v46 = vsub.f32 %v1590_v49, %v730_v45 }
 0xc83   :  { %v738_v47 = vrot.slane %v734_v46, 7 }
 0xc85   :  { %740 = vrot.lane.b32.xlu1 %v738_v47, %s1460_s2 }
 0xc8d   :  { %v721_v48 = vpop.permute.xlu0 %720 }
 0xc8e   :  { %v725_v51 = vadd.f32 %v721_v48, %v1501_v41 }
 0xc90   :  { %1336 = vtanh.f32 %v725_v51 }
 0xc96   :  { %v1337_v52 = vpop.eup %1336 }
 0xc97   :  { %v731_v53 = vrot.slane %v1337_v52, 1 }
 0xc99   :  { %v735_v54 = vsub.f32 %v1592_v50, %v731_v53 }
 0xc9b   :  { %v739_v55 = vrot.slane %v735_v54, 7 }
 0xc9d   :  { %742 = vrot.lane.b32.xlu2 %v739_v55, %s1460_s2 }
 0xcf7   :  { %v741_v56 = vpop.permute.xlu1 %740  ;;  %v743_v57 = vpop.permute.xlu2 %742 }
 0xcf8   :  { %v746_v58 = vmul.f32 %v741_v56, %v691_v35  ;;  %v747_v59 = vmul.f32 %v743_v57, %v706_v33 }
 0xcfa   :  { %750 = vrot.lane.b32.xlu0 %v746_v58, %s1461_s30  ;;  %752 = vrot.lane.b32.xlu1 %v747_v59, %s1461_s30 }
 0xd6c   :  { %v751_v60 = vpop.permute.xlu0 %750  ;;  %v753_v61 = vpop.permute.xlu1 %752 }
 0xd6d   :  { %v1616_v62 = vadd.f32 %v1335_v44, %v751_v60  ;;  %v1618_v63 = vadd.f32 %v1337_v52, %v753_v61 }
 0xd6f   :  { %v758_v0 = vpack.c.bf16 %v1616_v62, %v1616_v62  ;;  %v759_v1 = vpack.c.bf16 %v1618_v63, %v1618_v63 }
 0xd71   :  { %v762_v2 = vunpack.c.l.b16 %v758_v0  ;;  %v763_v3 = vunpack.c.l.b16 %v759_v1 }
 0xd73   :  { %v764_v4 = vrot.slane %v762_v2, 4  ;;  %v765_v5 = vrot.slane %v763_v3, 3 }
 0xd75   :  { %v766_v6 = vsel %vm275_vm9, %v765_v5, %v764_v4 }
 0xd76   :  { %v767_v7 = vpack.c.b16 %v766_v6, %v766_v6 }
 0xd78   :  { %768 = vrot.lane.b32.xlu2 %v767_v7, %s1459_s0 }
 0xdd2   :  { %v769_v8 = vpop.permute.xlu2 %768 }
 0xdd3   :  { %1233 = vmatmul.msk.bf16.vlgmr.msrb.gmra.mxu3 %vm98_vm0, %v769_v8 }
 0xe56   :  { %v782_v9 = vpop.f32.mrf.mxu3 }
 0xe57   :  { %v783_v10 = vadd.f32 %v1492_v24, %v782_v9 }
 0xe59   :  { %v787_v11 = vrot.slane %v783_v10, 3  ;;  %v788_v12 = vrot.slane %v783_v10, 4 }
 0xe5b   :  { %833 = vrot.lane.b32.xlu1 %v788_v12, %s1459_s0  ;;  %831 = vrot.lane.b32.xlu0 %v787_v11, %s1459_s0  ;;  %v791_v14 = vadd.f32 %v787_v11, %v1498_v37  ;;  %v792_v15 = vadd.f32 %v788_v12, %v1501_v41 }
 0xe5d   :  { %v1234_v16 = vmul.f32 -1.442695, %v791_v14  ;;  %v1235_v17 = vmul.f32 -1.442695, %v792_v15 }
 0xe5e   :  { %v784_v13 = vpop.f32.mrf.mxu3 }
 0xe5f   :  { %1338 = vpow2.f32 %v1234_v16 }
 0xe60   :  { %1340 = vpow2.f32 %v1235_v17 }
 0xe65   :  { %v1339_v18 = vpop.eup %1338 }
 0xe66   :  { %v1341_v19 = vpop.eup %1340  ;;  %v799_v20 = vadd.f32 1.0, %v1339_v18 }
 0xe67   :  { %v800_v22 = vadd.f32 1.0, %v1341_v19 }
 0xe68   :  { %1342 = vrcp.f32 %v799_v20  ;;  %vm806_vm1 = vweird.f32 %v799_v20  ;;  %v812_v40 = vand.u32 2147483648, %v799_v20  ;;  %v810_v43 = vand.u32 2147483647, %v799_v20 }
 0xe69   :  { %1344 = vrcp.f32 %v800_v22  ;;  %v827_v39 = vand.u32 2147483648, %v800_v22  ;;  %vm821_vm2 = vweird.f32 %v800_v22  ;;  %v825_v42 = vand.u32 2147483647, %v800_v22 }
 0xe6a   :  { %v813_v47 = vor.u32 1.1754944e-38, %v812_v40  ;;  %vm811_vm6 = vcmp.eq.f32.partialorder %v810_v43, 8.507059e+37 }
 0xe6b   :  { %v828_v46 = vor.u32 1.1754944e-38, %v827_v39  ;;  %vm826_vm5 = vcmp.eq.f32.partialorder %v825_v42, 8.507059e+37 }
 0xe6e   :  { %v1343_v24 = vpop.eup %1342 }
 0xe6f   :  { %v1345_v23 = vpop.eup %1344  ;;  %v802_v28 = vmul.f32 %v1343_v24, %v799_v20  ;;  %vm807_vm14 = vweird.f32 %v1343_v24 }
 0xe70   :  { %v817_v25 = vmul.f32 %v1345_v23, %v800_v22  ;;  %vm822_vm15 = vweird.f32 %v1345_v23  ;;  %vm808_vm3 = vmor %vm806_vm1, %vm807_vm14 }
 0xe71   :  { %v803_v31 = vsub.f32 1.0, %v802_v28  ;;  %vm823_vm4 = vmor %vm821_vm2, %vm822_vm15 }
 0xe72   :  { %v818_v30 = vsub.f32 1.0, %v817_v25  ;;  %v1653_v25 = vld [vmem:[#allocation6 + $0x2] ss:$0 sm:$0xff] }
 0xe73   :  { %v804_v33 = vmul.f32 %v1343_v24, %v803_v31 }
 0xe74   :  { %v819_v32 = vmul.f32 %v1345_v23, %v818_v30 }
 0xe75   :  { %v805_v35 = vadd.f32 %v1343_v24, %v804_v33 }
 0xe76   :  { %v820_v34 = vadd.f32 %v1345_v23, %v819_v32 }
 0xe77   :  { %v809_v45 = vsel %vm808_vm3, %v1343_v24, %v805_v35 }
 0xe78   :  { %v824_v44 = vsel %vm823_vm4, %v1345_v23, %v820_v34  ;;  %v814_v53 = vsel %vm811_vm6, %v813_v47, %v809_v45 }
 0xe79   :  { %v829_v51 = vsel %vm826_vm5, %v828_v46, %v824_v44 }
 0xecd   :  { %v834_v48 = vpop.permute.xlu1 %833  ;;  %v832_v52 = vpop.permute.xlu0 %831 }
 0xece   :  { %v838_v54 = vmul.f32 %v834_v48, %v829_v51  ;;  %v837_v55 = vmul.f32 %v832_v52, %v814_v53 }
 0xed0   :  { %843 = vrot.lane.b32.xlu0 %v838_v54, %s1459_s0  ;;  %841 = vrot.lane.b32.xlu2 %v837_v55, %s1459_s0 }
 0xf2a   :  { %v842_v56 = vpop.permute.xlu2 %841 }
 0xf2b   :  { %v847_v57 = vadd.f32 %v842_v56, %v1498_v37 }
 0xf2d   :  { %1346 = vtanh.f32 %v847_v57 }
 0xf33   :  { %v1347_v58 = vpop.eup %1346 }
 0xf34   :  { %v853_v59 = vrot.slane %v1347_v58, 1 }
 0xf36   :  { %v857_v60 = vsub.f32 %v1616_v62, %v853_v59 }
 0xf38   :  { %v861_v61 = vrot.slane %v857_v60, 7 }
 0xf3a   :  { %863 = vrot.lane.b32.xlu1 %v861_v61, %s1460_s2 }
 0xf42   :  { %v844_v0 = vpop.permute.xlu0 %843 }
 0xf43   :  { %v848_v1 = vadd.f32 %v844_v0, %v1501_v41 }
 0xf45   :  { %1348 = vtanh.f32 %v848_v1 }
 0xf4b   :  { %v1349_v2 = vpop.eup %1348 }
 0xf4c   :  { %v854_v3 = vrot.slane %v1349_v2, 1 }
 0xf4e   :  { %v858_v4 = vsub.f32 %v1618_v63, %v854_v3 }
 0xf50   :  { %v862_v5 = vrot.slane %v858_v4, 7 }
 0xf52   :  { %865 = vrot.lane.b32.xlu2 %v862_v5, %s1460_s2 }
 0xfac   :  { %v864_v6 = vpop.permute.xlu1 %863  ;;  %v866_v7 = vpop.permute.xlu2 %865 }
 0xfad   :  { %v869_v8 = vmul.f32 %v864_v6, %v814_v53  ;;  %v870_v9 = vmul.f32 %v866_v7, %v829_v51 }
 0xfaf   :  { %873 = vrot.lane.b32.xlu0 %v869_v8, %s1461_s30  ;;  %875 = vrot.lane.b32.xlu1 %v870_v9, %s1461_s30 }
0x1021   :  { %v874_v10 = vpop.permute.xlu0 %873  ;;  %v876_v11 = vpop.permute.xlu1 %875 }
0x1022   :  { %v1642_v12 = vadd.f32 %v1347_v58, %v874_v10  ;;  %v1644_v13 = vadd.f32 %v1349_v2, %v876_v11 }
0x1024   :  { %v881_v14 = vpack.c.bf16 %v1642_v12, %v1642_v12  ;;  %v882_v15 = vpack.c.bf16 %v1644_v13, %v1644_v13 }
0x1026   :  { %v885_v16 = vunpack.c.l.b16 %v881_v14  ;;  %v886_v17 = vunpack.c.l.b16 %v882_v15 }
0x1028   :  { %v887_v18 = vrot.slane %v885_v16, 5  ;;  %v888_v19 = vrot.slane %v886_v17, 4 }
0x102a   :  { %v889_v20 = vsel %vm275_vm9, %v888_v19, %v887_v18 }
0x102b   :  { %v890_v22 = vpack.c.b16 %v889_v20, %v889_v20 }
0x102d   :  { %891 = vrot.lane.b32.xlu2 %v890_v22, %s1459_s0 }
0x1087   :  { %v892_v24 = vpop.permute.xlu2 %891 }
0x1088   :  { %1236 = vmatmul.msk.bf16.vlgmr.msra.gmra.mxu0 %vm98_vm0, %v892_v24 }
0x1105   :  { %v905_v23 = vpop.f32.mrf.mxu0 }
0x1106   :  { %v906_v28 = vadd.f32 %v1653_v25, %v905_v23 }
0x1108   :  { %v910_v30 = vrot.slane %v906_v28, 2  ;;  %v911_v31 = vrot.slane %v906_v28, 3 }
0x110a   :  { %956 = vrot.lane.b32.xlu1 %v911_v31, %s1459_s0  ;;  %954 = vrot.lane.b32.xlu0 %v910_v30, %s1459_s0  ;;  %v914_v33 = vadd.f32 %v910_v30, %v1498_v37  ;;  %v915_v34 = vadd.f32 %v911_v31, %v1501_v41 }
0x110c   :  { %v1237_v35 = vmul.f32 -1.442695, %v914_v33  ;;  %v1238_v39 = vmul.f32 -1.442695, %v915_v34 }
0x110d   :  { %v907_v32 = vpop.f32.mrf.mxu0 }
0x110e   :  { %1350 = vpow2.f32 %v1237_v35 }
0x110f   :  { %1352 = vpow2.f32 %v1238_v39 }
0x1114   :  { %v1351_v40 = vpop.eup %1350 }
0x1115   :  { %v1353_v42 = vpop.eup %1352  ;;  %v922_v43 = vadd.f32 1.0, %v1351_v40 }
0x1116   :  { %v923_v44 = vadd.f32 1.0, %v1353_v42 }
0x1117   :  { %1354 = vrcp.f32 %v922_v43  ;;  %vm929_vm10 = vweird.f32 %v922_v43  ;;  %v935_v58 = vand.u32 2147483648, %v922_v43  ;;  %v933_v60 = vand.u32 2147483647, %v922_v43 }
0x1118   :  { %1356 = vrcp.f32 %v923_v44  ;;  %v950_v57 = vand.u32 2147483648, %v923_v44  ;;  %vm944_vm11 = vweird.f32 %v923_v44  ;;  %v948_v59 = vand.u32 2147483647, %v923_v44 }
0x1119   :  { %v936_v2 = vor.u32 1.1754944e-38, %v935_v58  ;;  %vm934_vm15 = vcmp.eq.f32.partialorder %v933_v60, 8.507059e+37 }
0x111a   :  { %v951_v1 = vor.u32 1.1754944e-38, %v950_v57  ;;  %vm949_vm14 = vcmp.eq.f32.partialorder %v948_v59, 8.507059e+37 }
0x111d   :  { %v1355_v45 = vpop.eup %1354 }
0x111e   :  { %v1357_v46 = vpop.eup %1356  ;;  %v925_v48 = vmul.f32 %v1355_v45, %v922_v43  ;;  %vm930_vm7 = vweird.f32 %v1355_v45 }
0x111f   :  { %v940_v47 = vmul.f32 %v1357_v46, %v923_v44  ;;  %vm945_vm8 = vweird.f32 %v1357_v46  ;;  %vm931_vm12 = vmor %vm929_vm10, %vm930_vm7  ;;  %vm1130_vm10 = vcmask 1041408  }
0x1120   :  { %v926_v52 = vsub.f32 1.0, %v925_v48  ;;  %vm946_vm13 = vmor %vm944_vm11, %vm945_vm8  ;;  %vm1127_vm8 = vcmask 1040384   ;;  %vm1133_vm11 = vcmask 1042432  }
0x1121   :  { %v941_v51 = vsub.f32 1.0, %v940_v47 }
0x1122   :  { %v927_v54 = vmul.f32 %v1355_v45, %v926_v52 }
0x1123   :  { %v942_v53 = vmul.f32 %v1357_v46, %v941_v51 }
0x1124   :  { %v928_v56 = vadd.f32 %v1355_v45, %v927_v54 }
0x1125   :  { %v943_v55 = vadd.f32 %v1357_v46, %v942_v53 }
0x1126   :  { %v932_v0 = vsel %vm931_vm12, %v1355_v45, %v928_v56  ;;  %vm1136_vm12 = vcmask 1043456  }
0x1127   :  { %v947_v61 = vsel %vm946_vm13, %v1357_v46, %v943_v55  ;;  %v937_v6 = vsel %vm934_vm15, %v936_v2, %v932_v0  ;;  %vm1139_vm13 = vcmask 1044480   ;;  %vm1145_vm15 = vcmask 1046528  }
0x1128   :  { %v952_v4 = vsel %vm949_vm14, %v951_v1, %v947_v61  ;;  %vm1142_vm14 = vcmask 1045504  }
0x117c   :  { %v957_v3 = vpop.permute.xlu1 %956  ;;  %v955_v5 = vpop.permute.xlu0 %954 }
0x117d   :  { %v961_v7 = vmul.f32 %v957_v3, %v952_v4  ;;  %v960_v8 = vmul.f32 %v955_v5, %v937_v6 }
0x117f   :  { %966 = vrot.lane.b32.xlu0 %v961_v7, %s1459_s0  ;;  %964 = vrot.lane.b32.xlu2 %v960_v8, %s1459_s0 }
0x11d9   :  { %v965_v9 = vpop.permute.xlu2 %964 }
0x11da   :  { %v970_v10 = vadd.f32 %v965_v9, %v1498_v37 }
0x11dc   :  { %1358 = vtanh.f32 %v970_v10 }
0x11e2   :  { %v1359_v11 = vpop.eup %1358 }
0x11e3   :  { %v976_v14 = vrot.slane %v1359_v11, 1 }
0x11e5   :  { %v980_v15 = vsub.f32 %v1642_v12, %v976_v14 }
0x11e7   :  { %v984_v16 = vrot.slane %v980_v15, 7 }
0x11e9   :  { %986 = vrot.lane.b32.xlu1 %v984_v16, %s1460_s2 }
0x11f1   :  { %v967_v17 = vpop.permute.xlu0 %966 }
0x11f2   :  { %v971_v18 = vadd.f32 %v967_v17, %v1501_v41 }
0x11f4   :  { %1360 = vtanh.f32 %v971_v18 }
0x11fa   :  { %v1361_v19 = vpop.eup %1360 }
0x11fb   :  { %v977_v20 = vrot.slane %v1361_v19, 1 }
0x11fd   :  { %v981_v22 = vsub.f32 %v1644_v13, %v977_v20 }
0x11ff   :  { %v985_v24 = vrot.slane %v981_v22, 7 }
0x1201   :  { %988 = vrot.lane.b32.xlu2 %v985_v24, %s1460_s2 }
0x125b   :  { %v987_v23 = vpop.permute.xlu1 %986  ;;  %v989_v28 = vpop.permute.xlu2 %988 }
0x125c   :  { %v992_v30 = vmul.f32 %v987_v23, %v937_v6  ;;  %v993_v31 = vmul.f32 %v989_v28, %v952_v4 }
0x125e   :  { %996 = vrot.lane.b32.xlu0 %v992_v30, %s1461_s30  ;;  %998 = vrot.lane.b32.xlu1 %v993_v31, %s1461_s30 }
0x12d0   :  { %v997_v32 = vpop.permute.xlu0 %996  ;;  %v999_v33 = vpop.permute.xlu1 %998 }
0x12d1   :  { %v1670_v34 = vadd.f32 %v1359_v11, %v997_v32  ;;  %v1672_v35 = vadd.f32 %v1361_v19, %v999_v33 }
0x12d3   :  { %v1004_v39 = vpack.c.bf16 %v1670_v34, %v1670_v34  ;;  %v1005_v40 = vpack.c.bf16 %v1672_v35, %v1672_v35 }
0x12d5   :  { %v1008_v42 = vunpack.c.l.b16 %v1004_v39  ;;  %v1009_v43 = vunpack.c.l.b16 %v1005_v40 }
0x12d7   :  { %v1010_v44 = vrot.slane %v1008_v42, 6  ;;  %v1011_v45 = vrot.slane %v1009_v43, 5 }
0x12d9   :  { %v1012_v46 = vsel %vm275_vm9, %v1011_v45, %v1010_v44 }
0x12da   :  { %v1013_v47 = vpack.c.b16 %v1012_v46, %v1012_v46 }
0x12dc   :  { %1014 = vrot.lane.b32.xlu2 %v1013_v47, %s1459_s0 }
0x1336   :  { %v1015_v48 = vpop.permute.xlu2 %1014 }
0x1337   :  { %1239 = vmatmul.msk.bf16.vlgmr.msra.gmra.mxu1 %vm98_vm0, %v1015_v48 }
0x13b4   :  { %v1028_v51 = vpop.f32.mrf.mxu1 }
0x13b5   :  { %v1029_v52 = vadd.f32 %v1653_v25, %v1028_v51 }
0x13b7   :  { %v1033_v53 = vrot.slane %v1029_v52, 1  ;;  %v1034_v54 = vrot.slane %v1029_v52, 2 }
0x13b9   :  { %1079 = vrot.lane.b32.xlu1 %v1034_v54, %s1459_s0  ;;  %1077 = vrot.lane.b32.xlu0 %v1033_v53, %s1459_s0  ;;  %v1037_v56 = vadd.f32 %v1033_v53, %v1498_v37  ;;  %v1038_v57 = vadd.f32 %v1034_v54, %v1501_v41 }
0x13bb   :  { %v1240_v58 = vmul.f32 -1.442695, %v1037_v56  ;;  %v1241_v59 = vmul.f32 -1.442695, %v1038_v57  ;;  %v1258_v56 = vld [vmem:[#allocation4 + $0x38] sm:$0xf0] }
0x13bc   :  { %v1030_v55 = vpop.f32.mrf.mxu1  ;;  %v1244_v57 = vld [vmem:[#allocation4 + $0xc] sm:$0xf] }
0x13bd   :  { %1362 = vpow2.f32 %v1240_v58  ;;  %v1248_v55 = vld [vmem:[#allocation4 + $0x2c] sm:$0xf]  ;;  %v1257_v58 = vld [vmem:[#allocation4 + $0x18] sm:$0xf0] }
0x13be   :  { %1364 = vpow2.f32 %v1241_v59  ;;  %v1245_v59 = vor.u32 %v1257_v58, %v1244_v57 }
0x13c3   :  { %v1363_v60 = vpop.eup %1362 }
0x13c4   :  { %v1365_v61 = vpop.eup %1364  ;;  %v1045_v0 = vadd.f32 1.0, %v1363_v60  ;;  %v1129_v60 = vsel %vm1127_vm8, %v1512_v21, %v1538_v27 }
0x13c5   :  { %v1046_v1 = vadd.f32 1.0, %v1365_v61  ;;  %v1128_v61 = vsel %vm1127_vm8, %v1516_v26, %v1540_v29 }
0x13c6   :  { %1366 = vrcp.f32 %v1045_v0  ;;  %vm1052_vm2 = vweird.f32 %v1045_v0  ;;  %v1058_v14 = vand.u32 2147483648, %v1045_v0  ;;  %v1056_v16 = vand.u32 2147483647, %v1045_v0 }
0x13c7   :  { %1368 = vrcp.f32 %v1046_v1  ;;  %v1073_v11 = vand.u32 2147483648, %v1046_v1  ;;  %vm1067_vm3 = vweird.f32 %v1046_v1  ;;  %v1071_v15 = vand.u32 2147483647, %v1046_v1 }
0x13c8   :  { %v1059_v20 = vor.u32 1.1754944e-38, %v1058_v14  ;;  %vm1057_vm7 = vcmp.eq.f32.partialorder %v1056_v16, 8.507059e+37 }
0x13c9   :  { %v1074_v19 = vor.u32 1.1754944e-38, %v1073_v11  ;;  %vm1072_vm6 = vcmp.eq.f32.partialorder %v1071_v15, 8.507059e+37 }
0x13cc   :  { %v1367_v25 = vpop.eup %1366 }
0x13cd   :  { %v1369_v2 = vpop.eup %1368  ;;  %v1048_v4 = vmul.f32 %v1367_v25, %v1045_v0  ;;  %vm1053_vm9 = vweird.f32 %v1367_v25  ;;  %v1131_v0 = vsel %vm1130_vm10, %v1128_v61, %v1564_v36 }
0x13ce   :  { %v1063_v3 = vmul.f32 %v1369_v2, %v1046_v1  ;;  %vm1068_vm1 = vweird.f32 %v1369_v2  ;;  %vm1054_vm4 = vmor %vm1052_vm2, %vm1053_vm9  ;;  %v1132_v1 = vsel %vm1130_vm10, %v1129_v60, %v1566_v38  ;;  %vm1184_vm9 = vcmask 31744  }
0x13cf   :  { %v1049_v6 = vsub.f32 1.0, %v1048_v4  ;;  %vm1069_vm5 = vmor %vm1067_vm3, %vm1068_vm1 }
0x13d0   :  { %v1064_v5 = vsub.f32 1.0, %v1063_v3 }
0x13d1   :  { %v1050_v8 = vmul.f32 %v1367_v25, %v1049_v6 }
0x13d2   :  { %v1065_v7 = vmul.f32 %v1369_v2, %v1064_v5 }
0x13d3   :  { %v1051_v10 = vadd.f32 %v1367_v25, %v1050_v8 }
0x13d4   :  { %v1066_v9 = vadd.f32 %v1369_v2, %v1065_v7 }
0x13d5   :  { %v1055_v18 = vsel %vm1054_vm4, %v1367_v25, %v1051_v10  ;;  %v1134_v25 = vsel %vm1133_vm11, %v1131_v0, %v1590_v49 }
0x13d6   :  { %v1070_v17 = vsel %vm1069_vm5, %v1369_v2, %v1066_v9  ;;  %v1060_v28 = vsel %vm1057_vm7, %v1059_v20, %v1055_v18  ;;  %v1135_v2 = vsel %vm1133_vm11, %v1132_v1, %v1592_v50  ;;  %v1137_v3 = vsel %vm1136_vm12, %v1134_v25, %v1616_v62 }
0x13d7   :  { %v1075_v24 = vsel %vm1072_vm6, %v1074_v19, %v1070_v17  ;;  %v1138_v4 = vsel %vm1136_vm12, %v1135_v2, %v1618_v63  ;;  %v1140_v26 = vsel %vm1139_vm13, %v1137_v3, %v1642_v12  ;;  %v1273_v63 = vld [vmem:[#allocation6 + $0x3] ss:$0 sm:$0xff] }
0x13d8   :  { %v1141_v27 = vsel %vm1139_vm13, %v1138_v4, %v1644_v13  ;;  %v1143_v38 = vsel %vm1142_vm14, %v1140_v26, %v1670_v34 }
0x13d9   :  { %v1144_v49 = vsel %vm1142_vm14, %v1141_v27, %v1672_v35 }
0x142b   :  { %v1080_v22 = vpop.permute.xlu1 %1079  ;;  %v1078_v23 = vpop.permute.xlu0 %1077 }
0x142c   :  { %v1084_v30 = vmul.f32 %v1080_v22, %v1075_v24  ;;  %v1083_v31 = vmul.f32 %v1078_v23, %v1060_v28 }
0x142e   :  { %1089 = vrot.lane.b32.xlu0 %v1084_v30, %s1459_s0  ;;  %1087 = vrot.lane.b32.xlu2 %v1083_v31, %s1459_s0 }
0x1488   :  { %v1088_v32 = vpop.permute.xlu2 %1087 }
0x1489   :  { %v1093_v33 = vadd.f32 %v1088_v32, %v1498_v37 }
0x148b   :  { %1370 = vtanh.f32 %v1093_v33 }
0x1491   :  { %v1371_v39 = vpop.eup %1370 }
0x1492   :  { %v1099_v40 = vrot.slane %v1371_v39, 1 }
0x1494   :  { %v1103_v42 = vsub.f32 %v1670_v34, %v1099_v40 }
0x1496   :  { %v1107_v43 = vrot.slane %v1103_v42, 7 }
0x1498   :  { %1109 = vrot.lane.b32.xlu1 %v1107_v43, %s1460_s2 }
0x14a0   :  { %v1090_v44 = vpop.permute.xlu0 %1089 }
0x14a1   :  { %v1094_v45 = vadd.f32 %v1090_v44, %v1501_v41  ;;  %v1249_v41 = vor.u32 %v1258_v56, %v1248_v55 }
0x14a3   :  { %1372 = vtanh.f32 %v1094_v45  ;;  %1176 = vmatpush.bf16.msra.mxu2 %v1249_v41 }
0x14a7   :  { %1177 = vmatpush.bf16.msra.mxu2 %v1245_v59 }
0x14a9   :  { %v1373_v46 = vpop.eup %1372 }
0x14aa   :  { %v1100_v47 = vrot.slane %v1373_v46, 1 }
0x14ac   :  { %v1104_v48 = vsub.f32 %v1672_v35, %v1100_v47 }
0x14ae   :  { %v1108_v51 = vrot.slane %v1104_v48, 7 }
0x14b0   :  { %1111 = vrot.lane.b32.xlu2 %v1108_v51, %s1460_s2 }
0x150a   :  { %v1110_v37 = vpop.permute.xlu1 %1109  ;;  %v1112_v52 = vpop.permute.xlu2 %1111 }
0x150b   :  { %v1115_v53 = vmul.f32 %v1110_v37, %v1060_v28  ;;  %v1116_v54 = vmul.f32 %v1112_v52, %v1075_v24 }
0x150d   :  { %1119 = vrot.lane.b32.xlu0 %v1115_v53, %s1461_s30  ;;  %1121 = vrot.lane.b32.xlu1 %v1116_v54, %s1461_s30 }
0x157f   :  { %v1120_v5 = vpop.permute.xlu0 %1119  ;;  %v1122_v21 = vpop.permute.xlu1 %1121 }
0x1580   :  { %v1125_v29 = vadd.f32 %v1371_v39, %v1120_v5  ;;  %v1126_v36 = vadd.f32 %v1373_v46, %v1122_v21 }
0x1582   :  { %v1146_v6 = vsel %vm1145_vm15, %v1143_v38, %v1125_v29  ;;  %v1147_v50 = vsel %vm1145_vm15, %v1144_v49, %v1126_v36 }
0x1583   :  { %v1148_v7 = vpack.c.bf16 %v1147_v50, %v1146_v6 }
0x1585   :  { %1153 = vrot.lane.b32.xlu2 %v1148_v7, %s1459_s0 }
0x15df   :  { %v1154_v62 = vpop.permute.xlu2 %1153 }
0x15e0   :  { %1250 = vmatmul.msk.bf16.vlgmr.msra.gmra.mxu2 %vm98_vm0, %v1154_v62 }
0x1663   :  { %v1179_v8 = vpop.f32.mrf.mxu2 }
0x1664   :  { %v1180_v12 = vadd.f32 %v1273_v63, %v1179_v8 }
0x1666   :  { %1185 = vst.msk [vmem:[%s1721_s3] sm:$0xff] %vm1184_vm9, %v1180_v12 }
0x166b   :  { %v1181_v13 = vpop.f32.mrf.mxu2 }
0x166c   :  { %v1182_v34 = vadd.f32 %v1273_v63, %v1181_v13 }
0x166e   :  { %1186 = vst.msk [vmem:[%s1721_s3 + $0x8] sm:$0xff] %vm1184_vm9, %v1182_v34 }
0x166f   :  { %1191 = vsyncpa [#allocation3], 1 }
0x1670   :  { %1192 = vsyncpa [#allocation5], 1 }

</bundles_post_ra>
